<compile_context>
chip_gen: v6e
topology: v6e:2x2x1
jax: 0.10.0
libtpu: 0.0.40
codegen_flags: <defaults>
</compile_context>

<pallas_src>
import numpy as np
import jax
import jax.numpy as jnp
from jax.experimental import pallas as pl
from jax.experimental.pallas import tpu as pltpu


# ----------------------------------------------------------------------------
# Fused Pallas kernel: hoisted input projection + 2-layer GRU + final Linear
# ----------------------------------------------------------------------------
def fused_gru_linear_kernel(emb_ref, h0_ref,
                            wi0p_ref, bi0p_ref, wh0p_ref,
                            w1i_ref, w1h_ref, b1_ref,
                            linw_ref, linb_ref,
                            logits_ref, hn_ref):
    H = wh0p_ref.shape[0]
    Bp = h0_ref.shape[1]                 # padded batch (= 8, one sublane group)
    S = emb_ref.shape[0] // Bp

    # Hoisted, batched layer-0 input projection over the whole sequence:
    # (S*Bp, E)bf16 @ (E, 4H)bf16 -> f32, bias already includes the layer-0
    # hidden-path bias (bh_r, bh_z added to cols 0:2H; bh_n sits in cols 3H:4H).
    gi0_all = (jnp.dot(emb_ref[...], wi0p_ref[...],
                       preferred_element_type=jnp.float32) + bi0p_ref[...])

    wh0 = wh0p_ref[...]      # bf16 (H, 4H)   cols [Wh_r, Wh_z, 0, Wh_n]
    w1i = w1i_ref[...]       # bf16 (H, 4H)   cols [Wi_r, Wi_z, Wi_n, 0]
    w1h = w1h_ref[...]       # bf16 (H, 4H)   cols [Wh_r, Wh_z, 0, Wh_n]
    b1 = b1_ref[...]         # f32  (1, 4H)   [bi_r+bh_r, bi_z+bh_z, bi_n, bh_n]
    linw = linw_ref[...]     # bf16 (H, Npad)
    linb = linb_ref[...]     # f32  (1, Npad)

    h_l0 = h0_ref[0]         # f32 (Bp, H) — h state kept in f32 for accuracy
    h_l1 = h0_ref[1]

    # S is small and static: fully unrolled recurrence inside one kernel call.
    for t in range(S):
        # Layer-1 hidden-path contribution: depends only on previous-step h_l1,
        # so this MXU issue is independent of the layer-0 chain (overlappable).
        gh1 = jnp.dot(h_l1.astype(jnp.bfloat16), w1h,
                      preferred_element_type=jnp.float32)

        # ---- layer 0: only the hidden-path matmul sits on the serial path ---
        g0 = (gi0_all[t * Bp:(t + 1) * Bp, :]
              + jnp.dot(h_l0.astype(jnp.bfloat16), wh0,
                        preferred_element_type=jnp.float32))
        s0 = jax.nn.sigmoid(g0[:, 0:2 * H])          # one EUP push for r and z
        r0 = s0[:, 0:H]
        z0 = s0[:, H:2 * H]
        n0 = jnp.tanh(g0[:, 2 * H:3 * H] + r0 * g0[:, 3 * H:4 * H])
        h_l0 = (1.0 - z0) * n0 + z0 * h_l0

        # ---- layer 1: input-path matmul + precomputed hidden-path term ------
        g1 = (jnp.dot(h_l0.astype(jnp.bfloat16), w1i,
                      preferred_element_type=jnp.float32) + gh1 + b1)
        s1 = jax.nn.sigmoid(g1[:, 0:2 * H])
        r1 = s1[:, 0:H]
        z1 = s1[:, H:2 * H]
        n1 = jnp.tanh(g1[:, 2 * H:3 * H] + r1 * g1[:, 3 * H:4 * H])
        h_l1 = (1.0 - z1) * n1 + z1 * h_l1

        # ---- fused per-step Linear; lane-dense, sublane-aligned store -------
        logits_ref[t * Bp:(t + 1) * Bp, :] = (
            jnp.dot(h_l1.astype(jnp.bfloat16), linw,
                    preferred_element_type=jnp.float32) + linb)

    hn_ref[0] = h_l0
    hn_ref[1] = h_l1


# ----------------------------------------------------------------------------
# Wrapper (embedding gather glue stays in XLA; everything else is one kernel)
# ----------------------------------------------------------------------------
def model_forward(input_ids, params, hidden=None):
    """Replicates TrainingModel_GRUVec.forward(input, hidden=None, mark=None)."""
    S, B = input_ids.shape
    H = params["hidden_dim"]
    N = params["n_out"]
    Npad = params["lin_w_pad"].shape[1]
    Bp = 8  # pad batch to one sublane group

    h0 = jnp.zeros((2, B, H), jnp.float32) if hidden is None else hidden
    h0_pad = jnp.zeros((2, Bp, H), jnp.float32).at[:, :B, :].set(h0)

    # --- embedding glue (gather + concat), mirroring the torch cat logic -----
    idx_change = jnp.concatenate([input_ids[0:2], input_ids[3:]], axis=0)
    emb_change = jnp.take(params["emb_train"], idx_change, axis=0)    # (S-1,B,E)
    emb_fix = jnp.take(params["emb_fix"], input_ids[2:3], axis=0)     # (1,B,E)
    embeds = jnp.concatenate([emb_change[0:2], emb_fix, emb_change[2:]], axis=0)
    E = embeds.shape[-1]
    emb_pad = jnp.zeros((S, Bp, E), jnp.float32).at[:, :B, :].set(embeds)
    emb2d = emb_pad.reshape(S * Bp, E).astype(jnp.bfloat16)

    full2 = lambda i: (0, 0)
    full3 = lambda i: (0, 0, 0)

    logits_pad, hidden_pad = pl.pallas_call(
        fused_gru_linear_kernel,
        out_shape=(jax.ShapeDtypeStruct((S * Bp, Npad), jnp.float32),
                   jax.ShapeDtypeStruct((2, Bp, H), jnp.float32)),
        grid=(1,),
        in_specs=[
            pl.BlockSpec((S * Bp, E), full2),       # embeds (seq-major, padded)
            pl.BlockSpec((2, Bp, H), full3),        # initial hidden (padded)
            pl.BlockSpec((E, 4 * H), full2),        # L0 input-path packed W
            pl.BlockSpec((1, 4 * H), full2),        # L0 combined packed bias
            pl.BlockSpec((H, 4 * H), full2),        # L0 hidden-path packed W
            pl.BlockSpec((H, 4 * H), full2),        # L1 input-path packed W
            pl.BlockSpec((H, 4 * H), full2),        # L1 hidden-path packed W
            pl.BlockSpec((1, 4 * H), full2),        # L1 combined packed bias
            pl.BlockSpec((H, Npad), full2),         # Linear W^T (lane padded)
            pl.BlockSpec((1, Npad), full2),         # Linear b   (lane padded)
        ],
        out_specs=[
            pl.BlockSpec((S * Bp, Npad), full2),    # padded logits
            pl.BlockSpec((2, Bp, H), full3),        # final hidden (padded)
        ],
        compiler_params=pltpu.CompilerParams(dimension_semantics=("arbitrary",)),
    )(emb2d, h0_pad,
      params["wi0p"], params["bi0p"], params["wh0p"],
      params["w1ip"], params["w1hp"], params["b1p"],
      params["lin_w_pad"], params["lin_b_pad"])

    logits = logits_pad.reshape(S, Bp, Npad)[:, :B, :N].reshape(S * B, N)
    hidden_n = hidden_pad[:, :B, :]
    return logits, hidden_n


# ----------------------------------------------------------------------------
# Pure-JAX reference (PyTorch semantics, f32) for verification
# ----------------------------------------------------------------------------
def _ref_gru_cell(x, h, w_ih, w_hh, b_ih, b_hh, H):
    gi = x @ w_ih.T + b_ih
    gh = h @ w_hh.T + b_hh
    r = jax.nn.sigmoid(gi[:, 0:H] + gh[:, 0:H])
    z = jax.nn.sigmoid(gi[:, H:2 * H] + gh[:, H:2 * H])
    n = jnp.tanh(gi[:, 2 * H:] + r * gh[:, 2 * H:])
    return (1.0 - z) * n + z * h


def reference_forward(input_ids, tp, hidden=None):
    S, B = input_ids.shape
    H = tp["hidden_dim"]
    h0 = jnp.zeros((2, B, H), jnp.float32) if hidden is None else hidden

    idx_change = jnp.concatenate([input_ids[0:2], input_ids[3:]], axis=0)
    emb_change = jnp.take(tp["emb_train"], idx_change, axis=0)
    emb_fix = jnp.take(tp["emb_fix"], input_ids[2:3], axis=0)
    embeds = jnp.concatenate([emb_change[0:2], emb_fix, emb_change[2:]], axis=0)

    h_l0, h_l1 = h0[0], h0[1]
    outs = []
    for t in range(S):
        h_l0 = _ref_gru_cell(embeds[t], h_l0, tp["w_ih_l0"], tp["w_hh_l0"],
                             tp["b_ih_l0"], tp["b_hh_l0"], H)
        h_l1 = _ref_gru_cell(h_l0, h_l1, tp["w_ih_l1"], tp["w_hh_l1"],
                             tp["b_ih_l1"], tp["b_hh_l1"], H)
        outs.append(h_l1)
    out = jnp.stack(outs, axis=0)
    logits = out.reshape(S * B, H) @ tp["lin_w"].T + tp["lin_b"]
    return logits, jnp.stack([h_l0, h_l1], axis=0)


# ----------------------------------------------------------------------------
# Deterministic parameter construction + packing for the fused kernel layout
# ----------------------------------------------------------------------------
def make_params(key, vocab_train, vocab_fix, E, H):
    keys = jax.random.split(key, 12)
    k = 1.0 / np.sqrt(H)
    u = lambda kk, shape: jax.random.uniform(kk, shape, jnp.float32, -k, k)

    tp = {
        "hidden_dim": H,
        "emb_train": jax.random.normal(keys[0], (vocab_train, E), jnp.float32),
        "emb_fix":   jax.random.normal(keys[1], (vocab_fix, E), jnp.float32),
        "w_ih_l0": u(keys[2], (3 * H, E)), "w_hh_l0": u(keys[3], (3 * H, H)),
        "b_ih_l0": u(keys[4], (3 * H,)),   "b_hh_l0": u(keys[5], (3 * H,)),
        "w_ih_l1": u(keys[6], (3 * H, H)), "w_hh_l1": u(keys[7], (3 * H, H)),
        "b_ih_l1": u(keys[8], (3 * H,)),   "b_hh_l1": u(keys[9], (3 * H,)),
        "lin_w": u(keys[10], (vocab_fix + vocab_train, H)),
        "lin_b": u(keys[11], (vocab_fix + vocab_train,)),
    }

    N = vocab_fix + vocab_train
    Npad = ((N + 127) // 128) * 128
    zH = jnp.zeros((H,), jnp.float32)

    def pack_w_in(w):   # (3H, in) -> (in, 4H), columns [Wi_r, Wi_z, Wi_n, 0]
        i = w.shape[1]
        return jnp.concatenate([w[0:H].T, w[H:2 * H].T, w[2 * H:3 * H].T,
                                jnp.zeros((i, H), jnp.float32)], axis=1)

    def pack_w_h(w):    # (3H, H) -> (H, 4H), columns [Wh_r, Wh_z, 0, Wh_n]
        return jnp.concatenate([w[0:H].T, w[H:2 * H].T,
                                jnp.zeros((H, H), jnp.float32),
                                w[2 * H:3 * H].T], axis=1)

    def pack_b_in(b):   # (3H,) -> (1, 4H): [bi_r, bi_z, bi_n, 0]
        return jnp.concatenate([b[0:H], b[H:2 * H], b[2 * H:3 * H],
                                zH]).reshape(1, 4 * H)

    def pack_b_h(b):    # (3H,) -> (1, 4H): [bh_r, bh_z, 0, bh_n]
        return jnp.concatenate([b[0:H], b[H:2 * H], zH,
                                b[2 * H:3 * H]]).reshape(1, 4 * H)

    bf = jnp.bfloat16
    kp = {
        "hidden_dim": H,
        "n_out": N,
        "emb_train": tp["emb_train"], "emb_fix": tp["emb_fix"],
        # Layer 0: input-path weights; bias = input bias + hidden bias (the
        # n-gate hidden bias bh_n lands in cols 3H:4H, so the gate math that
        # multiplies that block by r is unchanged).
        "wi0p": pack_w_in(tp["w_ih_l0"]).astype(bf),
        "bi0p": pack_b_in(tp["b_ih_l0"]) + pack_b_h(tp["b_hh_l0"]),
        "wh0p": pack_w_h(tp["w_hh_l0"]).astype(bf),
        # Layer 1: split input-path / hidden-path packed weights (no per-step
        # [x, h] lane-concat in the kernel), combined bias.
        "w1ip": pack_w_in(tp["w_ih_l1"]).astype(bf),
        "w1hp": pack_w_h(tp["w_hh_l1"]).astype(bf),
        "b1p": pack_b_in(tp["b_ih_l1"]) + pack_b_h(tp["b_hh_l1"]),
        "lin_w_pad": jnp.concatenate(
            [tp["lin_w"].T, jnp.zeros((H, Npad - N), jnp.float32)],
            axis=1).astype(bf),
        "lin_b_pad": jnp.concatenate(
            [tp["lin_b"], jnp.zeros((Npad - N,), jnp.float32)]).reshape(1, Npad),
    }
    return tp, kp


# ----------------------------------------------------------------------------
if __name__ == "__main__":
    vocab_train, vocab_fix = 11, 7
    E, H = 16, 32
    S, B = 8, 2

    key = jax.random.PRNGKey(0)
    k_in, k_par = jax.random.split(key)
    torch_p, kern_p = make_params(k_par, vocab_train, vocab_fix, E, H)

    # indices valid for both tables (row 2 indexes the fixed-embedding table)
    input_ids = jax.random.randint(k_in, (S, B), 0, min(vocab_train, vocab_fix),
                                   dtype=jnp.int32)

    logits, hidden = model_forward(input_ids, kern_p)
    logits = jax.block_until_ready(logits)
    hidden = jax.block_until_ready(hidden)

    assert logits.shape == (S * B, vocab_fix + vocab_train)
    assert hidden.shape == (2, B, H)

    # bf16 MXU operands (per performance review) -> relaxed tolerance vs the
    # f32 PyTorch-semantics reference.
    ref_logits, ref_hidden = reference_forward(input_ids, torch_p)
    np.testing.assert_allclose(np.asarray(logits), np.asarray(ref_logits),
                               rtol=2e-2, atol=2e-2)
    np.testing.assert_allclose(np.asarray(hidden), np.asarray(ref_hidden),
                               rtol=2e-2, atol=2e-2)

    print("KERNEL_OK")
</pallas_src>

<mosaic_0001>
module attributes {stable_mosaic.version = 11 : i64} {
  func.func @fused_gru_linear_kernel(%arg0: i32, %arg1: memref<64x16xbf16, #tpu.memory_space<vmem>>, %arg2: memref<2x8x32xf32, #tpu.memory_space<vmem>>, %arg3: memref<16x128xbf16, #tpu.memory_space<vmem>>, %arg4: memref<1x128xf32, #tpu.memory_space<vmem>>, %arg5: memref<32x128xbf16, #tpu.memory_space<vmem>>, %arg6: memref<32x128xbf16, #tpu.memory_space<vmem>>, %arg7: memref<32x128xbf16, #tpu.memory_space<vmem>>, %arg8: memref<1x128xf32, #tpu.memory_space<vmem>>, %arg9: memref<32x128xbf16, #tpu.memory_space<vmem>>, %arg10: memref<1x128xf32, #tpu.memory_space<vmem>>, %arg11: memref<64x128xf32, #tpu.memory_space<vmem>>, %arg12: memref<2x8x32xf32, #tpu.memory_space<vmem>>) attributes {dimension_semantics = [#tpu.dimension_semantics<arbitrary>], iteration_bounds = array<i64: 1>, scalar_prefetch = 0 : i64, scratch_operands = 0 : i64, tpu.core_type = #tpu.core_type<tc>, window_params = [{pipeline_mode = #tpu.pipeline_mode<synchronous>, transform_indices = @transform_0, window_bounds = array<i64: 64, 16>}, {pipeline_mode = #tpu.pipeline_mode<synchronous>, transform_indices = @transform_1, window_bounds = array<i64: 2, 8, 32>}, {pipeline_mode = #tpu.pipeline_mode<synchronous>, transform_indices = @transform_2, window_bounds = array<i64: 16, 128>}, {pipeline_mode = #tpu.pipeline_mode<synchronous>, transform_indices = @transform_3, window_bounds = array<i64: 1, 128>}, {pipeline_mode = #tpu.pipeline_mode<synchronous>, transform_indices = @transform_4, window_bounds = array<i64: 32, 128>}, {pipeline_mode = #tpu.pipeline_mode<synchronous>, transform_indices = @transform_5, window_bounds = array<i64: 32, 128>}, {pipeline_mode = #tpu.pipeline_mode<synchronous>, transform_indices = @transform_6, window_bounds = array<i64: 32, 128>}, {pipeline_mode = #tpu.pipeline_mode<synchronous>, transform_indices = @transform_7, window_bounds = array<i64: 1, 128>}, {pipeline_mode = #tpu.pipeline_mode<synchronous>, transform_indices = @transform_8, window_bounds = array<i64: 32, 128>}, {pipeline_mode = #tpu.pipeline_mode<synchronous>, transform_indices = @transform_9, window_bounds = array<i64: 1, 128>}, {pipeline_mode = #tpu.pipeline_mode<synchronous>, transform_indices = @transform_10, window_bounds = array<i64: 64, 128>}, {pipeline_mode = #tpu.pipeline_mode<synchronous>, transform_indices = @transform_11, window_bounds = array<i64: 2, 8, 32>}]} {
    %c0 = arith.constant 0 : index
    %c0_0 = arith.constant 0 : index
    %0 = vector.load %arg1[%c0, %c0_0] : memref<64x16xbf16, #tpu.memory_space<vmem>>, vector<64x16xbf16>
    %c0_1 = arith.constant 0 : index
    %c0_2 = arith.constant 0 : index
    %1 = vector.load %arg3[%c0_1, %c0_2] : memref<16x128xbf16, #tpu.memory_space<vmem>>, vector<16x128xbf16>
    %cst = arith.constant dense<0.000000e+00> : vector<64x128xf32>
    %2 = tpu.matmul %0, %1, %cst {dimension_numbers = #tpu.dot_dimension_numbers<[1], [0], [0], [1], [0, 0, 1, 1], [], []>} : vector<64x16xbf16>, vector<16x128xbf16>, vector<64x128xf32> -> vector<64x128xf32>
    %c0_3 = arith.constant 0 : index
    %c0_4 = arith.constant 0 : index
    %3 = vector.load %arg4[%c0_3, %c0_4] : memref<1x128xf32, #tpu.memory_space<vmem>>, vector<1x128xf32>
    %4 = vector.broadcast %3 : vector<1x128xf32> to vector<64x128xf32>
    %5 = arith.addf %2, %4 : vector<64x128xf32>
    %c0_5 = arith.constant 0 : index
    %c0_6 = arith.constant 0 : index
    %6 = vector.load %arg5[%c0_5, %c0_6] : memref<32x128xbf16, #tpu.memory_space<vmem>>, vector<32x128xbf16>
    %c0_7 = arith.constant 0 : index
    %c0_8 = arith.constant 0 : index
    %7 = vector.load %arg6[%c0_7, %c0_8] : memref<32x128xbf16, #tpu.memory_space<vmem>>, vector<32x128xbf16>
    %c0_9 = arith.constant 0 : index
    %c0_10 = arith.constant 0 : index
    %8 = vector.load %arg7[%c0_9, %c0_10] : memref<32x128xbf16, #tpu.memory_space<vmem>>, vector<32x128xbf16>
    %c0_11 = arith.constant 0 : index
    %c0_12 = arith.constant 0 : index
    %9 = vector.load %arg8[%c0_11, %c0_12] : memref<1x128xf32, #tpu.memory_space<vmem>>, vector<1x128xf32>
    %c0_13 = arith.constant 0 : index
    %c0_14 = arith.constant 0 : index
    %10 = vector.load %arg9[%c0_13, %c0_14] : memref<32x128xbf16, #tpu.memory_space<vmem>>, vector<32x128xbf16>
    %c0_15 = arith.constant 0 : index
    %c0_16 = arith.constant 0 : index
    %11 = vector.load %arg10[%c0_15, %c0_16] : memref<1x128xf32, #tpu.memory_space<vmem>>, vector<1x128xf32>
    %c0_17 = arith.constant 0 : index
    %c0_18 = arith.constant 0 : index
    %c0_19 = arith.constant 0 : index
    %12 = vector.load %arg2[%c0_17, %c0_18, %c0_19] : memref<2x8x32xf32, #tpu.memory_space<vmem>>, vector<1x8x32xf32>
    %13 = vector.shape_cast %12 : vector<1x8x32xf32> to vector<8x32xf32>
    %c1 = arith.constant 1 : index
    %c0_20 = arith.constant 0 : index
    %c0_21 = arith.constant 0 : index
    %14 = vector.load %arg2[%c1, %c0_20, %c0_21] : memref<2x8x32xf32, #tpu.memory_space<vmem>>, vector<1x8x32xf32>
    %15 = vector.shape_cast %14 : vector<1x8x32xf32> to vector<8x32xf32>
    %16 = arith.truncf %15 : vector<8x32xf32> to vector<8x32xbf16>
    %cst_22 = arith.constant dense<0.000000e+00> : vector<8x128xf32>
    %17 = tpu.matmul %16, %8, %cst_22 {dimension_numbers = #tpu.dot_dimension_numbers<[1], [0], [0], [1], [0, 0, 1, 1], [], []>} : vector<8x32xbf16>, vector<32x128xbf16>, vector<8x128xf32> -> vector<8x128xf32>
    %18 = vector.extract_strided_slice %5 {offsets = [0, 0], sizes = [8, 128], strides = [1, 1]} : vector<64x128xf32> to vector<8x128xf32>
    %19 = arith.truncf %13 : vector<8x32xf32> to vector<8x32xbf16>
    %cst_23 = arith.constant dense<0.000000e+00> : vector<8x128xf32>
    %20 = tpu.matmul %19, %6, %cst_23 {dimension_numbers = #tpu.dot_dimension_numbers<[1], [0], [0], [1], [0, 0, 1, 1], [], []>} : vector<8x32xbf16>, vector<32x128xbf16>, vector<8x128xf32> -> vector<8x128xf32>
    %21 = arith.addf %18, %20 : vector<8x128xf32>
    %22 = vector.extract_strided_slice %21 {offsets = [0, 0], sizes = [8, 64], strides = [1, 1]} : vector<8x128xf32> to vector<8x64xf32>
    %23 = arith.negf %22 : vector<8x64xf32>
    %24 = math.exp %23 : vector<8x64xf32>
    %cst_24 = arith.constant 1.000000e+00 : f32
    %25 = vector.broadcast %cst_24 : f32 to vector<8x64xf32>
    %26 = arith.addf %25, %24 : vector<8x64xf32>
    %27 = arith.divf %25, %26 : vector<8x64xf32>
    %28 = vector.extract_strided_slice %27 {offsets = [0, 0], sizes = [8, 32], strides = [1, 1]} : vector<8x64xf32> to vector<8x32xf32>
    %29 = vector.extract_strided_slice %27 {offsets = [0, 32], sizes = [8, 32], strides = [1, 1]} : vector<8x64xf32> to vector<8x32xf32>
    %30 = vector.extract_strided_slice %21 {offsets = [0, 64], sizes = [8, 32], strides = [1, 1]} : vector<8x128xf32> to vector<8x32xf32>
    %31 = vector.extract_strided_slice %21 {offsets = [0, 96], sizes = [8, 32], strides = [1, 1]} : vector<8x128xf32> to vector<8x32xf32>
    %32 = arith.mulf %28, %31 : vector<8x32xf32>
    %33 = arith.addf %30, %32 : vector<8x32xf32>
    %34 = math.tanh %33 : vector<8x32xf32>
    %cst_25 = arith.constant 1.000000e+00 : f32
    %35 = vector.broadcast %cst_25 : f32 to vector<8x32xf32>
    %36 = arith.subf %35, %29 : vector<8x32xf32>
    %37 = arith.mulf %36, %34 : vector<8x32xf32>
    %38 = arith.mulf %29, %13 : vector<8x32xf32>
    %39 = arith.addf %37, %38 : vector<8x32xf32>
    %40 = arith.truncf %39 : vector<8x32xf32> to vector<8x32xbf16>
    %cst_26 = arith.constant dense<0.000000e+00> : vector<8x128xf32>
    %41 = tpu.matmul %40, %7, %cst_26 {dimension_numbers = #tpu.dot_dimension_numbers<[1], [0], [0], [1], [0, 0, 1, 1], [], []>} : vector<8x32xbf16>, vector<32x128xbf16>, vector<8x128xf32> -> vector<8x128xf32>
    %42 = arith.addf %41, %17 : vector<8x128xf32>
    %43 = vector.broadcast %9 : vector<1x128xf32> to vector<8x128xf32>
    %44 = arith.addf %42, %43 : vector<8x128xf32>
    %45 = vector.extract_strided_slice %44 {offsets = [0, 0], sizes = [8, 64], strides = [1, 1]} : vector<8x128xf32> to vector<8x64xf32>
    %46 = arith.negf %45 : vector<8x64xf32>
    %47 = math.exp %46 : vector<8x64xf32>
    %cst_27 = arith.constant 1.000000e+00 : f32
    %48 = vector.broadcast %cst_27 : f32 to vector<8x64xf32>
    %49 = arith.addf %48, %47 : vector<8x64xf32>
    %50 = arith.divf %48, %49 : vector<8x64xf32>
    %51 = vector.extract_strided_slice %50 {offsets = [0, 0], sizes = [8, 32], strides = [1, 1]} : vector<8x64xf32> to vector<8x32xf32>
    %52 = vector.extract_strided_slice %50 {offsets = [0, 32], sizes = [8, 32], strides = [1, 1]} : vector<8x64xf32> to vector<8x32xf32>
    %53 = vector.extract_strided_slice %44 {offsets = [0, 64], sizes = [8, 32], strides = [1, 1]} : vector<8x128xf32> to vector<8x32xf32>
    %54 = vector.extract_strided_slice %44 {offsets = [0, 96], sizes = [8, 32], strides = [1, 1]} : vector<8x128xf32> to vector<8x32xf32>
    %55 = arith.mulf %51, %54 : vector<8x32xf32>
    %56 = arith.addf %53, %55 : vector<8x32xf32>
    %57 = math.tanh %56 : vector<8x32xf32>
    %cst_28 = arith.constant 1.000000e+00 : f32
    %58 = vector.broadcast %cst_28 : f32 to vector<8x32xf32>
    %59 = arith.subf %58, %52 : vector<8x32xf32>
    %60 = arith.mulf %59, %57 : vector<8x32xf32>
    %61 = arith.mulf %52, %15 : vector<8x32xf32>
    %62 = arith.addf %60, %61 : vector<8x32xf32>
    %63 = arith.truncf %62 : vector<8x32xf32> to vector<8x32xbf16>
    %cst_29 = arith.constant dense<0.000000e+00> : vector<8x128xf32>
    %64 = tpu.matmul %63, %10, %cst_29 {dimension_numbers = #tpu.dot_dimension_numbers<[1], [0], [0], [1], [0, 0, 1, 1], [], []>} : vector<8x32xbf16>, vector<32x128xbf16>, vector<8x128xf32> -> vector<8x128xf32>
    %65 = vector.broadcast %11 : vector<1x128xf32> to vector<8x128xf32>
    %66 = arith.addf %64, %65 : vector<8x128xf32>
    %c0_30 = arith.constant 0 : index
    %c0_31 = arith.constant 0 : index
    %67 = vector.load %arg11[%c0_30, %c0_31] : memref<64x128xf32, #tpu.memory_space<vmem>>, vector<8x128xf32>
    tpu.vector_store %arg11[%c0_30, %c0_31], %66 {strides = array<i32>} : memref<64x128xf32, #tpu.memory_space<vmem>>, vector<8x128xf32>,
    %68 = arith.truncf %62 : vector<8x32xf32> to vector<8x32xbf16>
    %cst_32 = arith.constant dense<0.000000e+00> : vector<8x128xf32>
    %69 = tpu.matmul %68, %8, %cst_32 {dimension_numbers = #tpu.dot_dimension_numbers<[1], [0], [0], [1], [0, 0, 1, 1], [], []>} : vector<8x32xbf16>, vector<32x128xbf16>, vector<8x128xf32> -> vector<8x128xf32>
    %70 = vector.extract_strided_slice %5 {offsets = [8, 0], sizes = [8, 128], strides = [1, 1]} : vector<64x128xf32> to vector<8x128xf32>
    %71 = arith.truncf %39 : vector<8x32xf32> to vector<8x32xbf16>
    %cst_33 = arith.constant dense<0.000000e+00> : vector<8x128xf32>
    %72 = tpu.matmul %71, %6, %cst_33 {dimension_numbers = #tpu.dot_dimension_numbers<[1], [0], [0], [1], [0, 0, 1, 1], [], []>} : vector<8x32xbf16>, vector<32x128xbf16>, vector<8x128xf32> -> vector<8x128xf32>
    %73 = arith.addf %70, %72 : vector<8x128xf32>
    %74 = vector.extract_strided_slice %73 {offsets = [0, 0], sizes = [8, 64], strides = [1, 1]} : vector<8x128xf32> to vector<8x64xf32>
    %75 = arith.negf %74 : vector<8x64xf32>
    %76 = math.exp %75 : vector<8x64xf32>
    %cst_34 = arith.constant 1.000000e+00 : f32
    %77 = vector.broadcast %cst_34 : f32 to vector<8x64xf32>
    %78 = arith.addf %77, %76 : vector<8x64xf32>
    %79 = arith.divf %77, %78 : vector<8x64xf32>
    %80 = vector.extract_strided_slice %79 {offsets = [0, 0], sizes = [8, 32], strides = [1, 1]} : vector<8x64xf32> to vector<8x32xf32>
    %81 = vector.extract_strided_slice %79 {offsets = [0, 32], sizes = [8, 32], strides = [1, 1]} : vector<8x64xf32> to vector<8x32xf32>
    %82 = vector.extract_strided_slice %73 {offsets = [0, 64], sizes = [8, 32], strides = [1, 1]} : vector<8x128xf32> to vector<8x32xf32>
    %83 = vector.extract_strided_slice %73 {offsets = [0, 96], sizes = [8, 32], strides = [1, 1]} : vector<8x128xf32> to vector<8x32xf32>
    %84 = arith.mulf %80, %83 : vector<8x32xf32>
    %85 = arith.addf %82, %84 : vector<8x32xf32>
    %86 = math.tanh %85 : vector<8x32xf32>
    %cst_35 = arith.constant 1.000000e+00 : f32
    %87 = vector.broadcast %cst_35 : f32 to vector<8x32xf32>
    %88 = arith.subf %87, %81 : vector<8x32xf32>
    %89 = arith.mulf %88, %86 : vector<8x32xf32>
    %90 = arith.mulf %81, %39 : vector<8x32xf32>
    %91 = arith.addf %89, %90 : vector<8x32xf32>
    %92 = arith.truncf %91 : vector<8x32xf32> to vector<8x32xbf16>
    %cst_36 = arith.constant dense<0.000000e+00> : vector<8x128xf32>
    %93 = tpu.matmul %92, %7, %cst_36 {dimension_numbers = #tpu.dot_dimension_numbers<[1], [0], [0], [1], [0, 0, 1, 1], [], []>} : vector<8x32xbf16>, vector<32x128xbf16>, vector<8x128xf32> -> vector<8x128xf32>
    %94 = arith.addf %93, %69 : vector<8x128xf32>
    %95 = vector.broadcast %9 : vector<1x128xf32> to vector<8x128xf32>
    %96 = arith.addf %94, %95 : vector<8x128xf32>
    %97 = vector.extract_strided_slice %96 {offsets = [0, 0], sizes = [8, 64], strides = [1, 1]} : vector<8x128xf32> to vector<8x64xf32>
    %98 = arith.negf %97 : vector<8x64xf32>
    %99 = math.exp %98 : vector<8x64xf32>
    %cst_37 = arith.constant 1.000000e+00 : f32
    %100 = vector.broadcast %cst_37 : f32 to vector<8x64xf32>
    %101 = arith.addf %100, %99 : vector<8x64xf32>
    %102 = arith.divf %100, %101 : vector<8x64xf32>
    %103 = vector.extract_strided_slice %102 {offsets = [0, 0], sizes = [8, 32], strides = [1, 1]} : vector<8x64xf32> to vector<8x32xf32>
    %104 = vector.extract_strided_slice %102 {offsets = [0, 32], sizes = [8, 32], strides = [1, 1]} : vector<8x64xf32> to vector<8x32xf32>
    %105 = vector.extract_strided_slice %96 {offsets = [0, 64], sizes = [8, 32], strides = [1, 1]} : vector<8x128xf32> to vector<8x32xf32>
    %106 = vector.extract_strided_slice %96 {offsets = [0, 96], sizes = [8, 32], strides = [1, 1]} : vector<8x128xf32> to vector<8x32xf32>
    %107 = arith.mulf %103, %106 : vector<8x32xf32>
    %108 = arith.addf %105, %107 : vector<8x32xf32>
    %109 = math.tanh %108 : vector<8x32xf32>
    %cst_38 = arith.constant 1.000000e+00 : f32
    %110 = vector.broadcast %cst_38 : f32 to vector<8x32xf32>
    %111 = arith.subf %110, %104 : vector<8x32xf32>
    %112 = arith.mulf %111, %109 : vector<8x32xf32>
    %113 = arith.mulf %104, %62 : vector<8x32xf32>
    %114 = arith.addf %112, %113 : vector<8x32xf32>
    %115 = arith.truncf %114 : vector<8x32xf32> to vector<8x32xbf16>
    %cst_39 = arith.constant dense<0.000000e+00> : vector<8x128xf32>
    %116 = tpu.matmul %115, %10, %cst_39 {dimension_numbers = #tpu.dot_dimension_numbers<[1], [0], [0], [1], [0, 0, 1, 1], [], []>} : vector<8x32xbf16>, vector<32x128xbf16>, vector<8x128xf32> -> vector<8x128xf32>
    %117 = vector.broadcast %11 : vector<1x128xf32> to vector<8x128xf32>
    %118 = arith.addf %116, %117 : vector<8x128xf32>
    %c8 = arith.constant 8 : index
    %c0_40 = arith.constant 0 : index
    %119 = vector.load %arg11[%c8, %c0_40] : memref<64x128xf32, #tpu.memory_space<vmem>>, vector<8x128xf32>
    tpu.vector_store %arg11[%c8, %c0_40], %118 {strides = array<i32>} : memref<64x128xf32, #tpu.memory_space<vmem>>, vector<8x128xf32>,
    %120 = arith.truncf %114 : vector<8x32xf32> to vector<8x32xbf16>
    %cst_41 = arith.constant dense<0.000000e+00> : vector<8x128xf32>
    %121 = tpu.matmul %120, %8, %cst_41 {dimension_numbers = #tpu.dot_dimension_numbers<[1], [0], [0], [1], [0, 0, 1, 1], [], []>} : vector<8x32xbf16>, vector<32x128xbf16>, vector<8x128xf32> -> vector<8x128xf32>
    %122 = vector.extract_strided_slice %5 {offsets = [16, 0], sizes = [8, 128], strides = [1, 1]} : vector<64x128xf32> to vector<8x128xf32>
    %123 = arith.truncf %91 : vector<8x32xf32> to vector<8x32xbf16>
    %cst_42 = arith.constant dense<0.000000e+00> : vector<8x128xf32>
    %124 = tpu.matmul %123, %6, %cst_42 {dimension_numbers = #tpu.dot_dimension_numbers<[1], [0], [0], [1], [0, 0, 1, 1], [], []>} : vector<8x32xbf16>, vector<32x128xbf16>, vector<8x128xf32> -> vector<8x128xf32>
    %125 = arith.addf %122, %124 : vector<8x128xf32>
    %126 = vector.extract_strided_slice %125 {offsets = [0, 0], sizes = [8, 64], strides = [1, 1]} : vector<8x128xf32> to vector<8x64xf32>
    %127 = arith.negf %126 : vector<8x64xf32>
    %128 = math.exp %127 : vector<8x64xf32>
    %cst_43 = arith.constant 1.000000e+00 : f32
    %129 = vector.broadcast %cst_43 : f32 to vector<8x64xf32>
    %130 = arith.addf %129, %128 : vector<8x64xf32>
    %131 = arith.divf %129, %130 : vector<8x64xf32>
    %132 = vector.extract_strided_slice %131 {offsets = [0, 0], sizes = [8, 32], strides = [1, 1]} : vector<8x64xf32> to vector<8x32xf32>
    %133 = vector.extract_strided_slice %131 {offsets = [0, 32], sizes = [8, 32], strides = [1, 1]} : vector<8x64xf32> to vector<8x32xf32>
    %134 = vector.extract_strided_slice %125 {offsets = [0, 64], sizes = [8, 32], strides = [1, 1]} : vector<8x128xf32> to vector<8x32xf32>
    %135 = vector.extract_strided_slice %125 {offsets = [0, 96], sizes = [8, 32], strides = [1, 1]} : vector<8x128xf32> to vector<8x32xf32>
    %136 = arith.mulf %132, %135 : vector<8x32xf32>
    %137 = arith.addf %134, %136 : vector<8x32xf32>
    %138 = math.tanh %137 : vector<8x32xf32>
    %cst_44 = arith.constant 1.000000e+00 : f32
    %139 = vector.broadcast %cst_44 : f32 to vector<8x32xf32>
    %140 = arith.subf %139, %133 : vector<8x32xf32>
    %141 = arith.mulf %140, %138 : vector<8x32xf32>
    %142 = arith.mulf %133, %91 : vector<8x32xf32>
    %143 = arith.addf %141, %142 : vector<8x32xf32>
    %144 = arith.truncf %143 : vector<8x32xf32> to vector<8x32xbf16>
    %cst_45 = arith.constant dense<0.000000e+00> : vector<8x128xf32>
    %145 = tpu.matmul %144, %7, %cst_45 {dimension_numbers = #tpu.dot_dimension_numbers<[1], [0], [0], [1], [0, 0, 1, 1], [], []>} : vector<8x32xbf16>, vector<32x128xbf16>, vector<8x128xf32> -> vector<8x128xf32>
    %146 = arith.addf %145, %121 : vector<8x128xf32>
    %147 = vector.broadcast %9 : vector<1x128xf32> to vector<8x128xf32>
    %148 = arith.addf %146, %147 : vector<8x128xf32>
    %149 = vector.extract_strided_slice %148 {offsets = [0, 0], sizes = [8, 64], strides = [1, 1]} : vector<8x128xf32> to vector<8x64xf32>
    %150 = arith.negf %149 : vector<8x64xf32>
    %151 = math.exp %150 : vector<8x64xf32>
    %cst_46 = arith.constant 1.000000e+00 : f32
    %152 = vector.broadcast %cst_46 : f32 to vector<8x64xf32>
    %153 = arith.addf %152, %151 : vector<8x64xf32>
    %154 = arith.divf %152, %153 : vector<8x64xf32>
    %155 = vector.extract_strided_slice %154 {offsets = [0, 0], sizes = [8, 32], strides = [1, 1]} : vector<8x64xf32> to vector<8x32xf32>
    %156 = vector.extract_strided_slice %154 {offsets = [0, 32], sizes = [8, 32], strides = [1, 1]} : vector<8x64xf32> to vector<8x32xf32>
    %157 = vector.extract_strided_slice %148 {offsets = [0, 64], sizes = [8, 32], strides = [1, 1]} : vector<8x128xf32> to vector<8x32xf32>
    %158 = vector.extract_strided_slice %148 {offsets = [0, 96], sizes = [8, 32], strides = [1, 1]} : vector<8x128xf32> to vector<8x32xf32>
    %159 = arith.mulf %155, %158 : vector<8x32xf32>
    %160 = arith.addf %157, %159 : vector<8x32xf32>
    %161 = math.tanh %160 : vector<8x32xf32>
    %cst_47 = arith.constant 1.000000e+00 : f32
    %162 = vector.broadcast %cst_47 : f32 to vector<8x32xf32>
    %163 = arith.subf %162, %156 : vector<8x32xf32>
    %164 = arith.mulf %163, %161 : vector<8x32xf32>
    %165 = arith.mulf %156, %114 : vector<8x32xf32>
    %166 = arith.addf %164, %165 : vector<8x32xf32>
    %167 = arith.truncf %166 : vector<8x32xf32> to vector<8x32xbf16>
    %cst_48 = arith.constant dense<0.000000e+00> : vector<8x128xf32>
    %168 = tpu.matmul %167, %10, %cst_48 {dimension_numbers = #tpu.dot_dimension_numbers<[1], [0], [0], [1], [0, 0, 1, 1], [], []>} : vector<8x32xbf16>, vector<32x128xbf16>, vector<8x128xf32> -> vector<8x128xf32>
    %169 = vector.broadcast %11 : vector<1x128xf32> to vector<8x128xf32>
    %170 = arith.addf %168, %169 : vector<8x128xf32>
    %c16 = arith.constant 16 : index
    %c0_49 = arith.constant 0 : index
    %171 = vector.load %arg11[%c16, %c0_49] : memref<64x128xf32, #tpu.memory_space<vmem>>, vector<8x128xf32>
    tpu.vector_store %arg11[%c16, %c0_49], %170 {strides = array<i32>} : memref<64x128xf32, #tpu.memory_space<vmem>>, vector<8x128xf32>,
    %172 = arith.truncf %166 : vector<8x32xf32> to vector<8x32xbf16>
    %cst_50 = arith.constant dense<0.000000e+00> : vector<8x128xf32>
    %173 = tpu.matmul %172, %8, %cst_50 {dimension_numbers = #tpu.dot_dimension_numbers<[1], [0], [0], [1], [0, 0, 1, 1], [], []>} : vector<8x32xbf16>, vector<32x128xbf16>, vector<8x128xf32> -> vector<8x128xf32>
    %174 = vector.extract_strided_slice %5 {offsets = [24, 0], sizes = [8, 128], strides = [1, 1]} : vector<64x128xf32> to vector<8x128xf32>
    %175 = arith.truncf %143 : vector<8x32xf32> to vector<8x32xbf16>
    %cst_51 = arith.constant dense<0.000000e+00> : vector<8x128xf32>
    %176 = tpu.matmul %175, %6, %cst_51 {dimension_numbers = #tpu.dot_dimension_numbers<[1], [0], [0], [1], [0, 0, 1, 1], [], []>} : vector<8x32xbf16>, vector<32x128xbf16>, vector<8x128xf32> -> vector<8x128xf32>
    %177 = arith.addf %174, %176 : vector<8x128xf32>
    %178 = vector.extract_strided_slice %177 {offsets = [0, 0], sizes = [8, 64], strides = [1, 1]} : vector<8x128xf32> to vector<8x64xf32>
    %179 = arith.negf %178 : vector<8x64xf32>
    %180 = math.exp %179 : vector<8x64xf32>
    %cst_52 = arith.constant 1.000000e+00 : f32
    %181 = vector.broadcast %cst_52 : f32 to vector<8x64xf32>
    %182 = arith.addf %181, %180 : vector<8x64xf32>
    %183 = arith.divf %181, %182 : vector<8x64xf32>
    %184 = vector.extract_strided_slice %183 {offsets = [0, 0], sizes = [8, 32], strides = [1, 1]} : vector<8x64xf32> to vector<8x32xf32>
    %185 = vector.extract_strided_slice %183 {offsets = [0, 32], sizes = [8, 32], strides = [1, 1]} : vector<8x64xf32> to vector<8x32xf32>
    %186 = vector.extract_strided_slice %177 {offsets = [0, 64], sizes = [8, 32], strides = [1, 1]} : vector<8x128xf32> to vector<8x32xf32>
    %187 = vector.extract_strided_slice %177 {offsets = [0, 96], sizes = [8, 32], strides = [1, 1]} : vector<8x128xf32> to vector<8x32xf32>
    %188 = arith.mulf %184, %187 : vector<8x32xf32>
    %189 = arith.addf %186, %188 : vector<8x32xf32>
    %190 = math.tanh %189 : vector<8x32xf32>
    %cst_53 = arith.constant 1.000000e+00 : f32
    %191 = vector.broadcast %cst_53 : f32 to vector<8x32xf32>
    %192 = arith.subf %191, %185 : vector<8x32xf32>
    %193 = arith.mulf %192, %190 : vector<8x32xf32>
    %194 = arith.mulf %185, %143 : vector<8x32xf32>
    %195 = arith.addf %193, %194 : vector<8x32xf32>
    %196 = arith.truncf %195 : vector<8x32xf32> to vector<8x32xbf16>
    %cst_54 = arith.constant dense<0.000000e+00> : vector<8x128xf32>
    %197 = tpu.matmul %196, %7, %cst_54 {dimension_numbers = #tpu.dot_dimension_numbers<[1], [0], [0], [1], [0, 0, 1, 1], [], []>} : vector<8x32xbf16>, vector<32x128xbf16>, vector<8x128xf32> -> vector<8x128xf32>
    %198 = arith.addf %197, %173 : vector<8x128xf32>
    %199 = vector.broadcast %9 : vector<1x128xf32> to vector<8x128xf32>
    %200 = arith.addf %198, %199 : vector<8x128xf32>
    %201 = vector.extract_strided_slice %200 {offsets = [0, 0], sizes = [8, 64], strides = [1, 1]} : vector<8x128xf32> to vector<8x64xf32>
    %202 = arith.negf %201 : vector<8x64xf32>
    %203 = math.exp %202 : vector<8x64xf32>
    %cst_55 = arith.constant 1.000000e+00 : f32
    %204 = vector.broadcast %cst_55 : f32 to vector<8x64xf32>
    %205 = arith.addf %204, %203 : vector<8x64xf32>
    %206 = arith.divf %204, %205 : vector<8x64xf32>
    %207 = vector.extract_strided_slice %206 {offsets = [0, 0], sizes = [8, 32], strides = [1, 1]} : vector<8x64xf32> to vector<8x32xf32>
    %208 = vector.extract_strided_slice %206 {offsets = [0, 32], sizes = [8, 32], strides = [1, 1]} : vector<8x64xf32> to vector<8x32xf32>
    %209 = vector.extract_strided_slice %200 {offsets = [0, 64], sizes = [8, 32], strides = [1, 1]} : vector<8x128xf32> to vector<8x32xf32>
    %210 = vector.extract_strided_slice %200 {offsets = [0, 96], sizes = [8, 32], strides = [1, 1]} : vector<8x128xf32> to vector<8x32xf32>
    %211 = arith.mulf %207, %210 : vector<8x32xf32>
    %212 = arith.addf %209, %211 : vector<8x32xf32>
    %213 = math.tanh %212 : vector<8x32xf32>
    %cst_56 = arith.constant 1.000000e+00 : f32
    %214 = vector.broadcast %cst_56 : f32 to vector<8x32xf32>
    %215 = arith.subf %214, %208 : vector<8x32xf32>
    %216 = arith.mulf %215, %213 : vector<8x32xf32>
    %217 = arith.mulf %208, %166 : vector<8x32xf32>
    %218 = arith.addf %216, %217 : vector<8x32xf32>
    %219 = arith.truncf %218 : vector<8x32xf32> to vector<8x32xbf16>
    %cst_57 = arith.constant dense<0.000000e+00> : vector<8x128xf32>
    %220 = tpu.matmul %219, %10, %cst_57 {dimension_numbers = #tpu.dot_dimension_numbers<[1], [0], [0], [1], [0, 0, 1, 1], [], []>} : vector<8x32xbf16>, vector<32x128xbf16>, vector<8x128xf32> -> vector<8x128xf32>
    %221 = vector.broadcast %11 : vector<1x128xf32> to vector<8x128xf32>
    %222 = arith.addf %220, %221 : vector<8x128xf32>
    %c24 = arith.constant 24 : index
    %c0_58 = arith.constant 0 : index
    %223 = vector.load %arg11[%c24, %c0_58] : memref<64x128xf32, #tpu.memory_space<vmem>>, vector<8x128xf32>
    tpu.vector_store %arg11[%c24, %c0_58], %222 {strides = array<i32>} : memref<64x128xf32, #tpu.memory_space<vmem>>, vector<8x128xf32>,
    %224 = arith.truncf %218 : vector<8x32xf32> to vector<8x32xbf16>
    %cst_59 = arith.constant dense<0.000000e+00> : vector<8x128xf32>
    %225 = tpu.matmul %224, %8, %cst_59 {dimension_numbers = #tpu.dot_dimension_numbers<[1], [0], [0], [1], [0, 0, 1, 1], [], []>} : vector<8x32xbf16>, vector<32x128xbf16>, vector<8x128xf32> -> vector<8x128xf32>
    %226 = vector.extract_strided_slice %5 {offsets = [32, 0], sizes = [8, 128], strides = [1, 1]} : vector<64x128xf32> to vector<8x128xf32>
    %227 = arith.truncf %195 : vector<8x32xf32> to vector<8x32xbf16>
    %cst_60 = arith.constant dense<0.000000e+00> : vector<8x128xf32>
    %228 = tpu.matmul %227, %6, %cst_60 {dimension_numbers = #tpu.dot_dimension_numbers<[1], [0], [0], [1], [0, 0, 1, 1], [], []>} : vector<8x32xbf16>, vector<32x128xbf16>, vector<8x128xf32> -> vector<8x128xf32>
    %229 = arith.addf %226, %228 : vector<8x128xf32>
    %230 = vector.extract_strided_slice %229 {offsets = [0, 0], sizes = [8, 64], strides = [1, 1]} : vector<8x128xf32> to vector<8x64xf32>
    %231 = arith.negf %230 : vector<8x64xf32>
    %232 = math.exp %231 : vector<8x64xf32>
    %cst_61 = arith.constant 1.000000e+00 : f32
    %233 = vector.broadcast %cst_61 : f32 to vector<8x64xf32>
    %234 = arith.addf %233, %232 : vector<8x64xf32>
    %235 = arith.divf %233, %234 : vector<8x64xf32>
    %236 = vector.extract_strided_slice %235 {offsets = [0, 0], sizes = [8, 32], strides = [1, 1]} : vector<8x64xf32> to vector<8x32xf32>
    %237 = vector.extract_strided_slice %235 {offsets = [0, 32], sizes = [8, 32], strides = [1, 1]} : vector<8x64xf32> to vector<8x32xf32>
    %238 = vector.extract_strided_slice %229 {offsets = [0, 64], sizes = [8, 32], strides = [1, 1]} : vector<8x128xf32> to vector<8x32xf32>
    %239 = vector.extract_strided_slice %229 {offsets = [0, 96], sizes = [8, 32], strides = [1, 1]} : vector<8x128xf32> to vector<8x32xf32>
    %240 = arith.mulf %236, %239 : vector<8x32xf32>
    %241 = arith.addf %238, %240 : vector<8x32xf32>
    %242 = math.tanh %241 : vector<8x32xf32>
    %cst_62 = arith.constant 1.000000e+00 : f32
    %243 = vector.broadcast %cst_62 : f32 to vector<8x32xf32>
    %244 = arith.subf %243, %237 : vector<8x32xf32>
    %245 = arith.mulf %244, %242 : vector<8x32xf32>
    %246 = arith.mulf %237, %195 : vector<8x32xf32>
    %247 = arith.addf %245, %246 : vector<8x32xf32>
    %248 = arith.truncf %247 : vector<8x32xf32> to vector<8x32xbf16>
    %cst_63 = arith.constant dense<0.000000e+00> : vector<8x128xf32>
    %249 = tpu.matmul %248, %7, %cst_63 {dimension_numbers = #tpu.dot_dimension_numbers<[1], [0], [0], [1], [0, 0, 1, 1], [], []>} : vector<8x32xbf16>, vector<32x128xbf16>, vector<8x128xf32> -> vector<8x128xf32>
    %250 = arith.addf %249, %225 : vector<8x128xf32>
    %251 = vector.broadcast %9 : vector<1x128xf32> to vector<8x128xf32>
    %252 = arith.addf %250, %251 : vector<8x128xf32>
    %253 = vector.extract_strided_slice %252 {offsets = [0, 0], sizes = [8, 64], strides = [1, 1]} : vector<8x128xf32> to vector<8x64xf32>
    %254 = arith.negf %253 : vector<8x64xf32>
    %255 = math.exp %254 : vector<8x64xf32>
    %cst_64 = arith.constant 1.000000e+00 : f32
    %256 = vector.broadcast %cst_64 : f32 to vector<8x64xf32>
    %257 = arith.addf %256, %255 : vector<8x64xf32>
    %258 = arith.divf %256, %257 : vector<8x64xf32>
    %259 = vector.extract_strided_slice %258 {offsets = [0, 0], sizes = [8, 32], strides = [1, 1]} : vector<8x64xf32> to vector<8x32xf32>
    %260 = vector.extract_strided_slice %258 {offsets = [0, 32], sizes = [8, 32], strides = [1, 1]} : vector<8x64xf32> to vector<8x32xf32>
    %261 = vector.extract_strided_slice %252 {offsets = [0, 64], sizes = [8, 32], strides = [1, 1]} : vector<8x128xf32> to vector<8x32xf32>
    %262 = vector.extract_strided_slice %252 {offsets = [0, 96], sizes = [8, 32], strides = [1, 1]} : vector<8x128xf32> to vector<8x32xf32>
    %263 = arith.mulf %259, %262 : vector<8x32xf32>
    %264 = arith.addf %261, %263 : vector<8x32xf32>
    %265 = math.tanh %264 : vector<8x32xf32>
    %cst_65 = arith.constant 1.000000e+00 : f32
    %266 = vector.broadcast %cst_65 : f32 to vector<8x32xf32>
    %267 = arith.subf %266, %260 : vector<8x32xf32>
    %268 = arith.mulf %267, %265 : vector<8x32xf32>
    %269 = arith.mulf %260, %218 : vector<8x32xf32>
    %270 = arith.addf %268, %269 : vector<8x32xf32>
    %271 = arith.truncf %270 : vector<8x32xf32> to vector<8x32xbf16>
    %cst_66 = arith.constant dense<0.000000e+00> : vector<8x128xf32>
    %272 = tpu.matmul %271, %10, %cst_66 {dimension_numbers = #tpu.dot_dimension_numbers<[1], [0], [0], [1], [0, 0, 1, 1], [], []>} : vector<8x32xbf16>, vector<32x128xbf16>, vector<8x128xf32> -> vector<8x128xf32>
    %273 = vector.broadcast %11 : vector<1x128xf32> to vector<8x128xf32>
    %274 = arith.addf %272, %273 : vector<8x128xf32>
    %c32 = arith.constant 32 : index
    %c0_67 = arith.constant 0 : index
    %275 = vector.load %arg11[%c32, %c0_67] : memref<64x128xf32, #tpu.memory_space<vmem>>, vector<8x128xf32>
    tpu.vector_store %arg11[%c32, %c0_67], %274 {strides = array<i32>} : memref<64x128xf32, #tpu.memory_space<vmem>>, vector<8x128xf32>,
    %276 = arith.truncf %270 : vector<8x32xf32> to vector<8x32xbf16>
    %cst_68 = arith.constant dense<0.000000e+00> : vector<8x128xf32>
    %277 = tpu.matmul %276, %8, %cst_68 {dimension_numbers = #tpu.dot_dimension_numbers<[1], [0], [0], [1], [0, 0, 1, 1], [], []>} : vector<8x32xbf16>, vector<32x128xbf16>, vector<8x128xf32> -> vector<8x128xf32>
    %278 = vector.extract_strided_slice %5 {offsets = [40, 0], sizes = [8, 128], strides = [1, 1]} : vector<64x128xf32> to vector<8x128xf32>
    %279 = arith.truncf %247 : vector<8x32xf32> to vector<8x32xbf16>
    %cst_69 = arith.constant dense<0.000000e+00> : vector<8x128xf32>
    %280 = tpu.matmul %279, %6, %cst_69 {dimension_numbers = #tpu.dot_dimension_numbers<[1], [0], [0], [1], [0, 0, 1, 1], [], []>} : vector<8x32xbf16>, vector<32x128xbf16>, vector<8x128xf32> -> vector<8x128xf32>
    %281 = arith.addf %278, %280 : vector<8x128xf32>
    %282 = vector.extract_strided_slice %281 {offsets = [0, 0], sizes = [8, 64], strides = [1, 1]} : vector<8x128xf32> to vector<8x64xf32>
    %283 = arith.negf %282 : vector<8x64xf32>
    %284 = math.exp %283 : vector<8x64xf32>
    %cst_70 = arith.constant 1.000000e+00 : f32
    %285 = vector.broadcast %cst_70 : f32 to vector<8x64xf32>
    %286 = arith.addf %285, %284 : vector<8x64xf32>
    %287 = arith.divf %285, %286 : vector<8x64xf32>
    %288 = vector.extract_strided_slice %287 {offsets = [0, 0], sizes = [8, 32], strides = [1, 1]} : vector<8x64xf32> to vector<8x32xf32>
    %289 = vector.extract_strided_slice %287 {offsets = [0, 32], sizes = [8, 32], strides = [1, 1]} : vector<8x64xf32> to vector<8x32xf32>
    %290 = vector.extract_strided_slice %281 {offsets = [0, 64], sizes = [8, 32], strides = [1, 1]} : vector<8x128xf32> to vector<8x32xf32>
    %291 = vector.extract_strided_slice %281 {offsets = [0, 96], sizes = [8, 32], strides = [1, 1]} : vector<8x128xf32> to vector<8x32xf32>
    %292 = arith.mulf %288, %291 : vector<8x32xf32>
    %293 = arith.addf %290, %292 : vector<8x32xf32>
    %294 = math.tanh %293 : vector<8x32xf32>
    %cst_71 = arith.constant 1.000000e+00 : f32
    %295 = vector.broadcast %cst_71 : f32 to vector<8x32xf32>
    %296 = arith.subf %295, %289 : vector<8x32xf32>
    %297 = arith.mulf %296, %294 : vector<8x32xf32>
    %298 = arith.mulf %289, %247 : vector<8x32xf32>
    %299 = arith.addf %297, %298 : vector<8x32xf32>
    %300 = arith.truncf %299 : vector<8x32xf32> to vector<8x32xbf16>
    %cst_72 = arith.constant dense<0.000000e+00> : vector<8x128xf32>
    %301 = tpu.matmul %300, %7, %cst_72 {dimension_numbers = #tpu.dot_dimension_numbers<[1], [0], [0], [1], [0, 0, 1, 1], [], []>} : vector<8x32xbf16>, vector<32x128xbf16>, vector<8x128xf32> -> vector<8x128xf32>
    %302 = arith.addf %301, %277 : vector<8x128xf32>
    %303 = vector.broadcast %9 : vector<1x128xf32> to vector<8x128xf32>
    %304 = arith.addf %302, %303 : vector<8x128xf32>
    %305 = vector.extract_strided_slice %304 {offsets = [0, 0], sizes = [8, 64], strides = [1, 1]} : vector<8x128xf32> to vector<8x64xf32>
    %306 = arith.negf %305 : vector<8x64xf32>
    %307 = math.exp %306 : vector<8x64xf32>
    %cst_73 = arith.constant 1.000000e+00 : f32
    %308 = vector.broadcast %cst_73 : f32 to vector<8x64xf32>
    %309 = arith.addf %308, %307 : vector<8x64xf32>
    %310 = arith.divf %308, %309 : vector<8x64xf32>
    %311 = vector.extract_strided_slice %310 {offsets = [0, 0], sizes = [8, 32], strides = [1, 1]} : vector<8x64xf32> to vector<8x32xf32>
    %312 = vector.extract_strided_slice %310 {offsets = [0, 32], sizes = [8, 32], strides = [1, 1]} : vector<8x64xf32> to vector<8x32xf32>
    %313 = vector.extract_strided_slice %304 {offsets = [0, 64], sizes = [8, 32], strides = [1, 1]} : vector<8x128xf32> to vector<8x32xf32>
    %314 = vector.extract_strided_slice %304 {offsets = [0, 96], sizes = [8, 32], strides = [1, 1]} : vector<8x128xf32> to vector<8x32xf32>
    %315 = arith.mulf %311, %314 : vector<8x32xf32>
    %316 = arith.addf %313, %315 : vector<8x32xf32>
    %317 = math.tanh %316 : vector<8x32xf32>
    %cst_74 = arith.constant 1.000000e+00 : f32
    %318 = vector.broadcast %cst_74 : f32 to vector<8x32xf32>
    %319 = arith.subf %318, %312 : vector<8x32xf32>
    %320 = arith.mulf %319, %317 : vector<8x32xf32>
    %321 = arith.mulf %312, %270 : vector<8x32xf32>
    %322 = arith.addf %320, %321 : vector<8x32xf32>
    %323 = arith.truncf %322 : vector<8x32xf32> to vector<8x32xbf16>
    %cst_75 = arith.constant dense<0.000000e+00> : vector<8x128xf32>
    %324 = tpu.matmul %323, %10, %cst_75 {dimension_numbers = #tpu.dot_dimension_numbers<[1], [0], [0], [1], [0, 0, 1, 1], [], []>} : vector<8x32xbf16>, vector<32x128xbf16>, vector<8x128xf32> -> vector<8x128xf32>
    %325 = vector.broadcast %11 : vector<1x128xf32> to vector<8x128xf32>
    %326 = arith.addf %324, %325 : vector<8x128xf32>
    %c40 = arith.constant 40 : index
    %c0_76 = arith.constant 0 : index
    %327 = vector.load %arg11[%c40, %c0_76] : memref<64x128xf32, #tpu.memory_space<vmem>>, vector<8x128xf32>
    tpu.vector_store %arg11[%c40, %c0_76], %326 {strides = array<i32>} : memref<64x128xf32, #tpu.memory_space<vmem>>, vector<8x128xf32>,
    %328 = arith.truncf %322 : vector<8x32xf32> to vector<8x32xbf16>
    %cst_77 = arith.constant dense<0.000000e+00> : vector<8x128xf32>
    %329 = tpu.matmul %328, %8, %cst_77 {dimension_numbers = #tpu.dot_dimension_numbers<[1], [0], [0], [1], [0, 0, 1, 1], [], []>} : vector<8x32xbf16>, vector<32x128xbf16>, vector<8x128xf32> -> vector<8x128xf32>
    %330 = vector.extract_strided_slice %5 {offsets = [48, 0], sizes = [8, 128], strides = [1, 1]} : vector<64x128xf32> to vector<8x128xf32>
    %331 = arith.truncf %299 : vector<8x32xf32> to vector<8x32xbf16>
    %cst_78 = arith.constant dense<0.000000e+00> : vector<8x128xf32>
    %332 = tpu.matmul %331, %6, %cst_78 {dimension_numbers = #tpu.dot_dimension_numbers<[1], [0], [0], [1], [0, 0, 1, 1], [], []>} : vector<8x32xbf16>, vector<32x128xbf16>, vector<8x128xf32> -> vector<8x128xf32>
    %333 = arith.addf %330, %332 : vector<8x128xf32>
    %334 = vector.extract_strided_slice %333 {offsets = [0, 0], sizes = [8, 64], strides = [1, 1]} : vector<8x128xf32> to vector<8x64xf32>
    %335 = arith.negf %334 : vector<8x64xf32>
    %336 = math.exp %335 : vector<8x64xf32>
    %cst_79 = arith.constant 1.000000e+00 : f32
    %337 = vector.broadcast %cst_79 : f32 to vector<8x64xf32>
    %338 = arith.addf %337, %336 : vector<8x64xf32>
    %339 = arith.divf %337, %338 : vector<8x64xf32>
    %340 = vector.extract_strided_slice %339 {offsets = [0, 0], sizes = [8, 32], strides = [1, 1]} : vector<8x64xf32> to vector<8x32xf32>
    %341 = vector.extract_strided_slice %339 {offsets = [0, 32], sizes = [8, 32], strides = [1, 1]} : vector<8x64xf32> to vector<8x32xf32>
    %342 = vector.extract_strided_slice %333 {offsets = [0, 64], sizes = [8, 32], strides = [1, 1]} : vector<8x128xf32> to vector<8x32xf32>
    %343 = vector.extract_strided_slice %333 {offsets = [0, 96], sizes = [8, 32], strides = [1, 1]} : vector<8x128xf32> to vector<8x32xf32>
    %344 = arith.mulf %340, %343 : vector<8x32xf32>
    %345 = arith.addf %342, %344 : vector<8x32xf32>
    %346 = math.tanh %345 : vector<8x32xf32>
    %cst_80 = arith.constant 1.000000e+00 : f32
    %347 = vector.broadcast %cst_80 : f32 to vector<8x32xf32>
    %348 = arith.subf %347, %341 : vector<8x32xf32>
    %349 = arith.mulf %348, %346 : vector<8x32xf32>
    %350 = arith.mulf %341, %299 : vector<8x32xf32>
    %351 = arith.addf %349, %350 : vector<8x32xf32>
    %352 = arith.truncf %351 : vector<8x32xf32> to vector<8x32xbf16>
    %cst_81 = arith.constant dense<0.000000e+00> : vector<8x128xf32>
    %353 = tpu.matmul %352, %7, %cst_81 {dimension_numbers = #tpu.dot_dimension_numbers<[1], [0], [0], [1], [0, 0, 1, 1], [], []>} : vector<8x32xbf16>, vector<32x128xbf16>, vector<8x128xf32> -> vector<8x128xf32>
    %354 = arith.addf %353, %329 : vector<8x128xf32>
    %355 = vector.broadcast %9 : vector<1x128xf32> to vector<8x128xf32>
    %356 = arith.addf %354, %355 : vector<8x128xf32>
    %357 = vector.extract_strided_slice %356 {offsets = [0, 0], sizes = [8, 64], strides = [1, 1]} : vector<8x128xf32> to vector<8x64xf32>
    %358 = arith.negf %357 : vector<8x64xf32>
    %359 = math.exp %358 : vector<8x64xf32>
    %cst_82 = arith.constant 1.000000e+00 : f32
    %360 = vector.broadcast %cst_82 : f32 to vector<8x64xf32>
    %361 = arith.addf %360, %359 : vector<8x64xf32>
    %362 = arith.divf %360, %361 : vector<8x64xf32>
    %363 = vector.extract_strided_slice %362 {offsets = [0, 0], sizes = [8, 32], strides = [1, 1]} : vector<8x64xf32> to vector<8x32xf32>
    %364 = vector.extract_strided_slice %362 {offsets = [0, 32], sizes = [8, 32], strides = [1, 1]} : vector<8x64xf32> to vector<8x32xf32>
    %365 = vector.extract_strided_slice %356 {offsets = [0, 64], sizes = [8, 32], strides = [1, 1]} : vector<8x128xf32> to vector<8x32xf32>
    %366 = vector.extract_strided_slice %356 {offsets = [0, 96], sizes = [8, 32], strides = [1, 1]} : vector<8x128xf32> to vector<8x32xf32>
    %367 = arith.mulf %363, %366 : vector<8x32xf32>
    %368 = arith.addf %365, %367 : vector<8x32xf32>
    %369 = math.tanh %368 : vector<8x32xf32>
    %cst_83 = arith.constant 1.000000e+00 : f32
    %370 = vector.broadcast %cst_83 : f32 to vector<8x32xf32>
    %371 = arith.subf %370, %364 : vector<8x32xf32>
    %372 = arith.mulf %371, %369 : vector<8x32xf32>
    %373 = arith.mulf %364, %322 : vector<8x32xf32>
    %374 = arith.addf %372, %373 : vector<8x32xf32>
    %375 = arith.truncf %374 : vector<8x32xf32> to vector<8x32xbf16>
    %cst_84 = arith.constant dense<0.000000e+00> : vector<8x128xf32>
    %376 = tpu.matmul %375, %10, %cst_84 {dimension_numbers = #tpu.dot_dimension_numbers<[1], [0], [0], [1], [0, 0, 1, 1], [], []>} : vector<8x32xbf16>, vector<32x128xbf16>, vector<8x128xf32> -> vector<8x128xf32>
    %377 = vector.broadcast %11 : vector<1x128xf32> to vector<8x128xf32>
    %378 = arith.addf %376, %377 : vector<8x128xf32>
    %c48 = arith.constant 48 : index
    %c0_85 = arith.constant 0 : index
    %379 = vector.load %arg11[%c48, %c0_85] : memref<64x128xf32, #tpu.memory_space<vmem>>, vector<8x128xf32>
    tpu.vector_store %arg11[%c48, %c0_85], %378 {strides = array<i32>} : memref<64x128xf32, #tpu.memory_space<vmem>>, vector<8x128xf32>,
    %380 = arith.truncf %374 : vector<8x32xf32> to vector<8x32xbf16>
    %cst_86 = arith.constant dense<0.000000e+00> : vector<8x128xf32>
    %381 = tpu.matmul %380, %8, %cst_86 {dimension_numbers = #tpu.dot_dimension_numbers<[1], [0], [0], [1], [0, 0, 1, 1], [], []>} : vector<8x32xbf16>, vector<32x128xbf16>, vector<8x128xf32> -> vector<8x128xf32>
    %382 = vector.extract_strided_slice %5 {offsets = [56, 0], sizes = [8, 128], strides = [1, 1]} : vector<64x128xf32> to vector<8x128xf32>
    %383 = arith.truncf %351 : vector<8x32xf32> to vector<8x32xbf16>
    %cst_87 = arith.constant dense<0.000000e+00> : vector<8x128xf32>
    %384 = tpu.matmul %383, %6, %cst_87 {dimension_numbers = #tpu.dot_dimension_numbers<[1], [0], [0], [1], [0, 0, 1, 1], [], []>} : vector<8x32xbf16>, vector<32x128xbf16>, vector<8x128xf32> -> vector<8x128xf32>
    %385 = arith.addf %382, %384 : vector<8x128xf32>
    %386 = vector.extract_strided_slice %385 {offsets = [0, 0], sizes = [8, 64], strides = [1, 1]} : vector<8x128xf32> to vector<8x64xf32>
    %387 = arith.negf %386 : vector<8x64xf32>
    %388 = math.exp %387 : vector<8x64xf32>
    %cst_88 = arith.constant 1.000000e+00 : f32
    %389 = vector.broadcast %cst_88 : f32 to vector<8x64xf32>
    %390 = arith.addf %389, %388 : vector<8x64xf32>
    %391 = arith.divf %389, %390 : vector<8x64xf32>
    %392 = vector.extract_strided_slice %391 {offsets = [0, 0], sizes = [8, 32], strides = [1, 1]} : vector<8x64xf32> to vector<8x32xf32>
    %393 = vector.extract_strided_slice %391 {offsets = [0, 32], sizes = [8, 32], strides = [1, 1]} : vector<8x64xf32> to vector<8x32xf32>
    %394 = vector.extract_strided_slice %385 {offsets = [0, 64], sizes = [8, 32], strides = [1, 1]} : vector<8x128xf32> to vector<8x32xf32>
    %395 = vector.extract_strided_slice %385 {offsets = [0, 96], sizes = [8, 32], strides = [1, 1]} : vector<8x128xf32> to vector<8x32xf32>
    %396 = arith.mulf %392, %395 : vector<8x32xf32>
    %397 = arith.addf %394, %396 : vector<8x32xf32>
    %398 = math.tanh %397 : vector<8x32xf32>
    %cst_89 = arith.constant 1.000000e+00 : f32
    %399 = vector.broadcast %cst_89 : f32 to vector<8x32xf32>
    %400 = arith.subf %399, %393 : vector<8x32xf32>
    %401 = arith.mulf %400, %398 : vector<8x32xf32>
    %402 = arith.mulf %393, %351 : vector<8x32xf32>
    %403 = arith.addf %401, %402 : vector<8x32xf32>
    %404 = arith.truncf %403 : vector<8x32xf32> to vector<8x32xbf16>
    %cst_90 = arith.constant dense<0.000000e+00> : vector<8x128xf32>
    %405 = tpu.matmul %404, %7, %cst_90 {dimension_numbers = #tpu.dot_dimension_numbers<[1], [0], [0], [1], [0, 0, 1, 1], [], []>} : vector<8x32xbf16>, vector<32x128xbf16>, vector<8x128xf32> -> vector<8x128xf32>
    %406 = arith.addf %405, %381 : vector<8x128xf32>
    %407 = vector.broadcast %9 : vector<1x128xf32> to vector<8x128xf32>
    %408 = arith.addf %406, %407 : vector<8x128xf32>
    %409 = vector.extract_strided_slice %408 {offsets = [0, 0], sizes = [8, 64], strides = [1, 1]} : vector<8x128xf32> to vector<8x64xf32>
    %410 = arith.negf %409 : vector<8x64xf32>
    %411 = math.exp %410 : vector<8x64xf32>
    %cst_91 = arith.constant 1.000000e+00 : f32
    %412 = vector.broadcast %cst_91 : f32 to vector<8x64xf32>
    %413 = arith.addf %412, %411 : vector<8x64xf32>
    %414 = arith.divf %412, %413 : vector<8x64xf32>
    %415 = vector.extract_strided_slice %414 {offsets = [0, 0], sizes = [8, 32], strides = [1, 1]} : vector<8x64xf32> to vector<8x32xf32>
    %416 = vector.extract_strided_slice %414 {offsets = [0, 32], sizes = [8, 32], strides = [1, 1]} : vector<8x64xf32> to vector<8x32xf32>
    %417 = vector.extract_strided_slice %408 {offsets = [0, 64], sizes = [8, 32], strides = [1, 1]} : vector<8x128xf32> to vector<8x32xf32>
    %418 = vector.extract_strided_slice %408 {offsets = [0, 96], sizes = [8, 32], strides = [1, 1]} : vector<8x128xf32> to vector<8x32xf32>
    %419 = arith.mulf %415, %418 : vector<8x32xf32>
    %420 = arith.addf %417, %419 : vector<8x32xf32>
    %421 = math.tanh %420 : vector<8x32xf32>
    %cst_92 = arith.constant 1.000000e+00 : f32
    %422 = vector.broadcast %cst_92 : f32 to vector<8x32xf32>
    %423 = arith.subf %422, %416 : vector<8x32xf32>
    %424 = arith.mulf %423, %421 : vector<8x32xf32>
    %425 = arith.mulf %416, %374 : vector<8x32xf32>
    %426 = arith.addf %424, %425 : vector<8x32xf32>
    %427 = arith.truncf %426 : vector<8x32xf32> to vector<8x32xbf16>
    %cst_93 = arith.constant dense<0.000000e+00> : vector<8x128xf32>
    %428 = tpu.matmul %427, %10, %cst_93 {dimension_numbers = #tpu.dot_dimension_numbers<[1], [0], [0], [1], [0, 0, 1, 1], [], []>} : vector<8x32xbf16>, vector<32x128xbf16>, vector<8x128xf32> -> vector<8x128xf32>
    %429 = vector.broadcast %11 : vector<1x128xf32> to vector<8x128xf32>
    %430 = arith.addf %428, %429 : vector<8x128xf32>
    %c56 = arith.constant 56 : index
    %c0_94 = arith.constant 0 : index
    %431 = vector.load %arg11[%c56, %c0_94] : memref<64x128xf32, #tpu.memory_space<vmem>>, vector<8x128xf32>
    tpu.vector_store %arg11[%c56, %c0_94], %430 {strides = array<i32>} : memref<64x128xf32, #tpu.memory_space<vmem>>, vector<8x128xf32>,
    %c0_95 = arith.constant 0 : index
    %c0_96 = arith.constant 0 : index
    %c0_97 = arith.constant 0 : index
    %432 = vector.load %arg12[%c0_95, %c0_96, %c0_97] : memref<2x8x32xf32, #tpu.memory_space<vmem>>, vector<1x8x32xf32>
    %433 = vector.shape_cast %432 : vector<1x8x32xf32> to vector<8x32xf32>
    %434 = vector.shape_cast %403 : vector<8x32xf32> to vector<1x8x32xf32>
    tpu.vector_store %arg12[%c0_95, %c0_96, %c0_97], %434 {strides = array<i32>} : memref<2x8x32xf32, #tpu.memory_space<vmem>>, vector<1x8x32xf32>,
    %c1_98 = arith.constant 1 : index
    %c0_99 = arith.constant 0 : index
    %c0_100 = arith.constant 0 : index
    %435 = vector.load %arg12[%c1_98, %c0_99, %c0_100] : memref<2x8x32xf32, #tpu.memory_space<vmem>>, vector<1x8x32xf32>
    %436 = vector.shape_cast %435 : vector<1x8x32xf32> to vector<8x32xf32>
    %437 = vector.shape_cast %426 : vector<8x32xf32> to vector<1x8x32xf32>
    tpu.vector_store %arg12[%c1_98, %c0_99, %c0_100], %437 {strides = array<i32>} : memref<2x8x32xf32, #tpu.memory_space<vmem>>, vector<1x8x32xf32>,
    return
  }
  func.func @transform_0(%arg0: i32) -> (i32, i32) {
    %c0_i32 = arith.constant 0 : i32
    %c0_i32_0 = arith.constant 0 : i32
    %c0_i32_1 = arith.constant 0 : i32
    return %c0_i32, %c0_i32_0 : i32, i32
  }
  func.func @transform_1(%arg0: i32) -> (i32, i32, i32) {
    %c0_i32 = arith.constant 0 : i32
    %c0_i32_0 = arith.constant 0 : i32
    %c0_i32_1 = arith.constant 0 : i32
    %c0_i32_2 = arith.constant 0 : i32
    return %c0_i32, %c0_i32_0, %c0_i32_1 : i32, i32, i32
  }
  func.func @transform_2(%arg0: i32) -> (i32, i32) {
    %c0_i32 = arith.constant 0 : i32
    %c0_i32_0 = arith.constant 0 : i32
    %c0_i32_1 = arith.constant 0 : i32
    return %c0_i32, %c0_i32_0 : i32, i32
  }
  func.func @transform_3(%arg0: i32) -> (i32, i32) {
    %c0_i32 = arith.constant 0 : i32
    %c0_i32_0 = arith.constant 0 : i32
    %c0_i32_1 = arith.constant 0 : i32
    return %c0_i32, %c0_i32_0 : i32, i32
  }
  func.func @transform_4(%arg0: i32) -> (i32, i32) {
    %c0_i32 = arith.constant 0 : i32
    %c0_i32_0 = arith.constant 0 : i32
    %c0_i32_1 = arith.constant 0 : i32
    return %c0_i32, %c0_i32_0 : i32, i32
  }
  func.func @transform_5(%arg0: i32) -> (i32, i32) {
    %c0_i32 = arith.constant 0 : i32
    %c0_i32_0 = arith.constant 0 : i32
    %c0_i32_1 = arith.constant 0 : i32
    return %c0_i32, %c0_i32_0 : i32, i32
  }
  func.func @transform_6(%arg0: i32) -> (i32, i32) {
    %c0_i32 = arith.constant 0 : i32
    %c0_i32_0 = arith.constant 0 : i32
    %c0_i32_1 = arith.constant 0 : i32
    return %c0_i32, %c0_i32_0 : i32, i32
  }
  func.func @transform_7(%arg0: i32) -> (i32, i32) {
    %c0_i32 = arith.constant 0 : i32
    %c0_i32_0 = arith.constant 0 : i32
    %c0_i32_1 = arith.constant 0 : i32
    return %c0_i32, %c0_i32_0 : i32, i32
  }
  func.func @transform_8(%arg0: i32) -> (i32, i32) {
    %c0_i32 = arith.constant 0 : i32
    %c0_i32_0 = arith.constant 0 : i32
    %c0_i32_1 = arith.constant 0 : i32
    return %c0_i32, %c0_i32_0 : i32, i32
  }
  func.func @transform_9(%arg0: i32) -> (i32, i32) {
    %c0_i32 = arith.constant 0 : i32
    %c0_i32_0 = arith.constant 0 : i32
    %c0_i32_1 = arith.constant 0 : i32
    return %c0_i32, %c0_i32_0 : i32, i32
  }
  func.func @transform_10(%arg0: i32) -> (i32, i32) {
    %c0_i32 = arith.constant 0 : i32
    %c0_i32_0 = arith.constant 0 : i32
    %c0_i32_1 = arith.constant 0 : i32
    return %c0_i32, %c0_i32_0 : i32, i32
  }
  func.func @transform_11(%arg0: i32) -> (i32, i32, i32) {
    %c0_i32 = arith.constant 0 : i32
    %c0_i32_0 = arith.constant 0 : i32
    %c0_i32_1 = arith.constant 0 : i32
    %c0_i32_2 = arith.constant 0 : i32
    return %c0_i32, %c0_i32_0, %c0_i32_1 : i32, i32, i32
  }
}

</mosaic_0001>

<bundles_post_ra>
// kernel: tpu_custom_call.1
= control target key start
LH: loop header
LB: loop body
LE: loop exit
PB: predicated region body
PF: predicated region fallthrough
CT: control target
= control target key end

     0   :  { %17 = vsyncpa [#allocation3], 0  ;;  %s3455_s0 = inlined_call_operand.vmem [shape: bf16[64,16], index: 0, kind: input, shape index: {}]   ;;  %s3456_s1 = inlined_call_operand.vmem [shape: f32[2,8,32], index: 1, kind: input, shape index: {}]   ;;  %s3457_s2 = inlined_call_operand.hbm [shape: bf16[16,128], index: 2, kind: input, shape index: {}]   ;;  %s3458_s3 = inlined_call_operand.vmem [shape: f32[1,128], index: 3, kind: input, shape index: {}]   ;;  %s3459_s4 = inlined_call_operand.vmem [shape: bf16[32,128], index: 4, kind: input, shape index: {}]   ;;  %s3460_s5 = inlined_call_operand.vmem [shape: bf16[32,128], index: 5, kind: input, shape index: {}]   ;;  %s3461_s6 = inlined_call_operand.hbm [shape: bf16[32,128], index: 6, kind: input, shape index: {}]   ;;  %s3462_s7 = inlined_call_operand.vmem [shape: f32[1,128], index: 7, kind: input, shape index: {}]   ;;  %s3463_s8 = inlined_call_operand.hbm [shape: bf16[32,128], index: 8, kind: input, shape index: {}]   ;;  %s3464_s9 = inlined_call_operand.vmem [shape: f32[1,128], index: 9, kind: input, shape index: {}]   ;;  %s3465_s10 = inlined_call_operand.hbm [shape: f32[64,128], index: 10, kind: output, shape index: {0}]   ;;  %s3466_s11 = inlined_call_operand.hbm [shape: f32[2,8,32], index: 11, kind: output, shape index: {1}]  }
   0x1   :  { %18 = vsyncpa [#allocation6], 0 }
   0x2   :  { %19 = vsyncpa [#allocation4], 0 }
   0x3   :  { %20 = vsyncpa [#allocation10], 0  ;;  %s2838_s17 = smov [#allocation5]   ;;  %s2839_s19 = smov [#allocation2]  }
   0x4   :  { %s48_s18 = sshll.u32 %s2838_s17, 4  ;;  %s30_s20 = sshll.u32 %s2839_s19, 4  ;;  %s49_s18 = int_to_ptr.vmem [resolvable:$true] %s48_s18  ;;  %s31_s20 = int_to_ptr.vmem [resolvable:$true] %s30_s20 }
   0x5   :  { %s2738_s21 = scalar_lea.vmem %s49_s18, 256  ;;  %p2743_p1 = scmp.lt.s32.totalorder %s49_s18, %s49_s18 }
   0x6   :  { %p2739_p0 = scmp.ne.s32.totalorder %s49_s18, %s2738_s21  ;;  %p2744_p2 = scmp.lt.s32.totalorder %s2738_s21, %s2738_s21 }
   0x8   :  { %p2745_p3 = por %p2744_p2, %p2743_p1 }
   0xa   :  { %p2746_p4 = pnand %p2745_p3, %p2739_p0 }
   0xc   :  { %2749 = shalt.err (!%p2746_p4)
}
   0xd   :  { %s2840_s22 = smov 64   ;;  %s2841_s23 = smov 4  }
   0xe   :  { %54 = dma.hbm_to_vmem [thread:$0]  %s3461_s6, 256, %s49_s18, [#allocation6], %s2840_s22, %s2840_s22, %s2841_s23  }
   0xf   :  { %s2758_s26 = scalar_lea.vmem %s31_s20, 128  ;;  %p2763_p6 = scmp.lt.s32.totalorder %s31_s20, %s31_s20 }
  0x10   :  { %p2759_p5 = scmp.ne.s32.totalorder %s31_s20, %s2758_s26  ;;  %p2764_p7 = scmp.lt.s32.totalorder %s2758_s26, %s2758_s26 }
  0x12   :  { %p2765_p8 = por %p2764_p7, %p2763_p6 }
  0x14   :  { %p2766_p9 = pnand %p2765_p8, %p2759_p5 }
  0x16   :  { %2769 = shalt.err (!%p2766_p9)
}
  0x17   :  { %36 = dma.hbm_to_vmem [thread:$0]  %s3457_s2, 128, %s31_s20, [#allocation3], %s2840_s22, %s2840_s22, %s2841_s23  }
  0x18   :  { %s2842_s29 = smov [#allocation7]  }
  0x19   :  { %s62_s30 = sshll.u32 %s2842_s29, 4  ;;  %s63_s30 = int_to_ptr.vmem [resolvable:$true] %s62_s30 }
  0x1a   :  { %s2778_s12 = scalar_lea.vmem %s63_s30, 256  ;;  %p2783_p11 = scmp.lt.s32.totalorder %s63_s30, %s63_s30 }
  0x1b   :  { %p2779_p10 = scmp.ne.s32.totalorder %s63_s30, %s2778_s12  ;;  %p2784_p12 = scmp.lt.s32.totalorder %s2778_s12, %s2778_s12 }
  0x1d   :  { %p2785_p13 = por %p2784_p12, %p2783_p11 }
  0x1f   :  { %p2786_p0 = pnand %p2785_p13, %p2779_p10 }
  0x21   :  { %2789 = shalt.err (!%p2786_p0)
}
  0x22   :  { %68 = dma.hbm_to_vmem [thread:$0]  %s3463_s8, 256, %s63_s30, [#allocation6], %s2840_s22, %s2840_s22, %s2841_s23  }
  0x23   :  { %2830 = dma.done.wait [#allocation3], 128  }
  0x24   :  { %2831 = vsyncadd [#allocation3], 4294967168 }
  0x25   :  { %2832 = dma.done.wait [#allocation6], 512  }
  0x26   :  { %2833 = vsyncadd [#allocation6], 4294966784  ;;  %v2843_v0 = vmov 0.0   ;;  %vm2844_vm0 = vmmov 0   ;;  %v2929_v1 = vld [vmem:[#allocation5 + $0x8] sm:$0xff]   ;;  %v2611_v2 = vld [vmem:[#allocation2] sm:$0xff]  }
  0x27   :  { %2341 = vmatprep.subr.bf16.mxu1 %v2843_v0  ;;  %2345 = vmatprep.mubr.msk.bf16.mxu1 %vm2844_vm0, %v2843_v0  ;;  %v2932_v3 = vld [vmem:[#allocation5] sm:$0xff]   ;;  %vm124_vm1 = vcmask 130048   ;;  %v2613_v4 = vld [vmem:[%s3455_s0] sm:$0xff]   ;;  %vm236_vm2 = vcmask 261120   ;;  %s2845_s26 = smov 32   ;;  %v2618_v34 = vld [vmem:[%s3455_s0 + $0x10] sm:$0xff]  }
  0x28   :  { %2342 = vmatpush3.bf16.msra.mxu1 %v2929_v1  ;;  %2331 = vmatprep.subr.bf16.mxu0 %v2611_v2  ;;  %v2614_v5 = vld [vmem:[%s3455_s0 + $0x8] sm:$0xff]   ;;  %v2961_v9 = vld [vmem:[%s3459_s4] sm:$0xff]   ;;  %v2619_v35 = vld [vmem:[%s3455_s0 + $0x18] sm:$0xff]   ;;  %s2846_s8 = smov 96  }
  0x29   :  { %2343 = vmatprep.subr.bf16.mxu1 %v2843_v0  ;;  %2332 = vmatpush3.bf16.msra.mxu0 %v2611_v2  ;;  %v2945_v6 = vld [vmem:[%s3456_s1 + $0x8] sm:$0xff]  ;;  %v220_v10 = vld [vmem:[%s3456_s1] sm:$0xff] }
  0x2a   :  { %2333 = vmatprep.mubr.msk.bf16.mxu0 %vm124_vm1, %v2613_v4  ;;  %2357 = vmatprep.subr.bf16.mxu0 %v2843_v0  ;;  %v223_v7 = vpack.c.bf16 %v2945_v6, %v2945_v6  ;;  %v2954_v8 = vld [vmem:[%s3459_s4 + $0x8] sm:$0xff]   ;;  %v280_v11 = vpack.c.bf16 %v220_v10, %v220_v10  ;;  %v2983_v15 = vld [vmem:[%s3458_s3] ss:$0 sm:$0xff] }
  0x2b   :  { %v2991_v33 = vld [vmem:[%s3460_s5 + $0x8] sm:$0xff]   ;;  %v3004_v37 = vld [vmem:[%s3460_s5] sm:$0xff]  }
  0x2c   :  { %2344 = vmatpush3.bf16.msra.mxu1 %v2932_v3  ;;  %2334 = vmatmul.mubr.msk.bf16.vlgmr.msra.gmra.mxu0 %vm124_vm1, %v2614_v5  ;;  %v3044_v52 = vld [vmem:[%s3462_s7] ss:$0 sm:$0xff] }
  0x2d   :  { %2349 = vmatprep.subr.bf16.mxu1 %v2843_v0  ;;  %2358 = vmatpush3.bf16.msra.mxu0 %v2991_v33 }
  0x2e   :  { %2337 = vmatprep.mubr.msk.bf16.mxu0 %vm124_vm1, %v2618_v34  ;;  %2359 = vmatprep.subr.bf16.mxu0 %v2843_v0 }
  0x2f   :  { %2346 = vmatmul.mubr.msk.bf16.vlgmr.msra.gmra.mxu1 %vm236_vm2, %v223_v7  ;;  %v3052_v7 = vld [vmem:[#allocation7 + $0x8] sm:$0xff]  }
  0x30   :  { %2350 = vmatpush3.bf16.msra.mxu1 %v2954_v8  ;;  %2353 = vmatprep.mubr.msk.bf16.mxu1 %vm2844_vm0, %v2843_v0 }
  0x31   :  { %2351 = vmatprep.subr.bf16.mxu1 %v2843_v0  ;;  %2360 = vmatpush3.bf16.msra.mxu0 %v3004_v37 }
  0x32   :  { %2373 = vmatprep.subr.bf16.mxu0 %v2843_v0 }
  0x34   :  { %2352 = vmatpush3.bf16.msra.mxu1 %v2961_v9  ;;  %2338 = vmatmul.mubr.msk.bf16.gmra.mxu0 %vm124_vm1, %v2619_v35 }
  0x35   :  { %2365 = vmatprep.subr.bf16.mxu1 %v2843_v0  ;;  %2361 = vmatprep.mubr.msk.bf16.mxu0 %vm2844_vm0, %v2843_v0 }
  0x37   :  { %2354 = vmatmul.mubr.msk.bf16.vlgmr.msra.gmra.mxu1 %vm236_vm2, %v280_v11 }
  0x38   :  { %2369 = vmatprep.mubr.msk.bf16.mxu1 %vm2844_vm0, %v2843_v0  ;;  %2366 = vmatpush3.bf16.msra.mxu1 %v3052_v7 }
  0x39   :  { %2367 = vmatprep.subr.bf16.mxu1 %v2843_v0 }
  0xec   :  { %v2978_v13 = vpop.f32.mrf.mxu0 }
  0xee   :  { %v171_v17 = vpop.f32.mrf.mxu0 }
  0xef   :  { %v2976_v12 = vpop.f32.mrf.mxu1  ;;  %v172_v19 = vadd.f32 %v2983_v15, %v171_v17 }
  0xf0   :  { %v3029_v46 = vpop.f32.mrf.mxu0 }
  0xf1   :  { %v2347_v14 = vpop.f32.mrf.mxu1 }
  0xf2   :  { %v3031_v47 = vpop.f32.mrf.mxu0 }
  0xf3   :  { %v277_v16 = vpop.f32.mrf.mxu1 }
  0xf4   :  { %v3033_v48 = vpop.f32.mrf.mxu0 }
  0xf5   :  { %v2348_v18 = vpop.f32.mrf.mxu1 }
  0xf6   :  { %v3035_v49 = vpop.f32.mrf.mxu0 }
  0xf7   :  { %v330_v20 = vpop.f32.mrf.mxu1 }
  0xf8   :  { %v336_v21 = vadd.f32 %v330_v20, %v172_v19  ;;  %v3037_v50 = vpop.f32.mrf.mxu0 }
  0xf9   :  { %v2355_v22 = vpop.f32.mrf.mxu1 }
  0xfa   :  { %344 = vrot.lane.b32.xlu0 %v336_v21, %s2845_s26  ;;  %v2178_v25 = vmul.f32 -1.442695, %v336_v21  ;;  %v3039_v51 = vpop.f32.mrf.mxu0 }
  0xfb   :  { %v333_v23 = vpop.f32.mrf.mxu1 }
  0xfc   :  { %2623 = vpow2.f32 %v2178_v25 }
  0xfd   :  { %v2356_v24 = vpop.f32.mrf.mxu1 }
 0x109   :  { %v2624_v26 = vpop.eup %2623 }
 0x10a   :  { %v340_v27 = vadd.f32 1.0, %v2624_v26 }
 0x10c   :  { %2625 = vrcp.f32 %v340_v27 }
 0x119   :  { %v2626_v28 = vpop.eup %2625 }
 0x11a   :  { %v354_v39 = vsub.f32 1.0, %v2626_v28 }
 0x16c   :  { %v345_v29 = vpop.permute.xlu0 %344 }
 0x16d   :  { %v347_v30 = vmul.f32 %v2626_v28, %v345_v29 }
 0x16f   :  { %349 = vrot.lane.b32.xlu0 %v347_v30, %s2840_s22 }
 0x1e1   :  { %v350_v31 = vpop.permute.xlu0 %349 }
 0x1e2   :  { %v352_v32 = vadd.f32 %v350_v31, %v336_v21  ;;  %v3091_v21 = vld [vmem:[%s3464_s9] ss:$0 sm:$0xff]  ;;  %v175_v31 = vadd.f32 %v2983_v15, %v3031_v47 }
 0x1e4   :  { %2627 = vtanh.f32 %v352_v32 }
 0x1f1   :  { %v2628_v36 = vpop.eup %2627 }
 0x1f2   :  { %356 = vrot.lane.b32.xlu1 %v2628_v36, %s2846_s8 }
 0x1f6   :  { %361 = vrot.lane.b32.xlu1 %v220_v10, %s2845_s26  ;;  %v3055_v10 = vld [vmem:[#allocation7] sm:$0xff]  }
 0x1f7   :  { %2368 = vmatpush3.bf16.msra.mxu1 %v3055_v10 }
 0x1f8   :  { %2381 = vmatprep.subr.bf16.mxu1 %v2843_v0 }
 0x264   :  { %v357_v38 = vpop.permute.xlu1 %356 }
 0x265   :  { %v359_v41 = vmul.f32 %v357_v38, %v354_v39 }
 0x268   :  { %v362_v40 = vpop.permute.xlu1 %361 }
 0x269   :  { %v364_v42 = vmul.f32 %v2626_v28, %v362_v40 }
 0x26b   :  { %v3014_v43 = vadd.f32 %v364_v42, %v359_v41 }
 0x26d   :  { %v366_v44 = vpack.c.bf16 %v3014_v43, %v3014_v43 }
 0x26f   :  { %368 = vrot.lane.b32.xlu0 %v366_v44, %s2846_s8 }
 0x2e1   :  { %v3019_v45 = vpop.permute.xlu0 %368 }
 0x2e2   :  { %2362 = vmatmul.mubr.msk.bf16.vlgmr.msra.gmra.mxu0 %vm236_vm2, %v3019_v45 }
 0x2e3   :  { %2374 = vmatpush3.bf16.msra.mxu0 %v2929_v1  ;;  %2377 = vmatprep.mubr.msk.bf16.mxu0 %vm2844_vm0, %v2843_v0 }
 0x2e4   :  { %2375 = vmatprep.subr.bf16.mxu0 %v2843_v0 }
 0x2e7   :  { %2376 = vmatpush3.bf16.msra.mxu0 %v2932_v3 }
 0x2e8   :  { %2389 = vmatprep.subr.bf16.mxu0 %v2843_v0 }
 0x3a2   :  { %v419_v53 = vpop.f32.mrf.mxu0 }
 0x3a3   :  { %v420_v54 = vadd.f32 %v419_v53, %v2976_v12 }
 0x3a4   :  { %v2363_v55 = vpop.f32.mrf.mxu0 }
 0x3a5   :  { %v431_v56 = vadd.f32 %v3044_v52, %v420_v54 }
 0x3a6   :  { %v422_v57 = vpop.f32.mrf.mxu0 }
 0x3a7   :  { %439 = vrot.lane.b32.xlu1 %v431_v56, %s2845_s26  ;;  %v2183_v59 = vmul.f32 -1.442695, %v431_v56 }
 0x3a8   :  { %v2364_v58 = vpop.f32.mrf.mxu0 }
 0x3a9   :  { %2629 = vpow2.f32 %v2183_v59 }
 0x3b6   :  { %v2630_v60 = vpop.eup %2629 }
 0x3b7   :  { %v435_v61 = vadd.f32 1.0, %v2630_v60 }
 0x3b9   :  { %2631 = vrcp.f32 %v435_v61 }
 0x3c6   :  { %v2632_v62 = vpop.eup %2631 }
 0x419   :  { %v440_v63 = vpop.permute.xlu1 %439 }
 0x41a   :  { %v442_v2 = vmul.f32 %v2632_v62, %v440_v63 }
 0x41c   :  { %444 = vrot.lane.b32.xlu0 %v442_v2, %s2840_s22 }
 0x420   :  { %456 = vrot.lane.b32.xlu0 %v2945_v6, %s2845_s26  ;;  %v449_v6 = vsub.f32 1.0, %v2632_v62 }
 0x48e   :  { %v445_v4 = vpop.permute.xlu0 %444 }
 0x48f   :  { %v447_v5 = vadd.f32 %v445_v4, %v431_v56 }
 0x491   :  { %2633 = vtanh.f32 %v447_v5 }
 0x492   :  { %v457_v12 = vpop.permute.xlu0 %456 }
 0x493   :  { %v459_v16 = vmul.f32 %v2632_v62, %v457_v12 }
 0x49e   :  { %v2634_v11 = vpop.eup %2633 }
 0x49f   :  { %451 = vrot.lane.b32.xlu1 %v2634_v11, %s2846_s8 }
 0x511   :  { %v452_v14 = vpop.permute.xlu1 %451 }
 0x512   :  { %v454_v17 = vmul.f32 %v452_v14, %v449_v6 }
 0x514   :  { %v3061_v18 = vadd.f32 %v459_v16, %v454_v17 }
 0x516   :  { %v461_v19 = vpack.c.bf16 %v3061_v18, %v3061_v18 }
 0x518   :  { %469 = vrot.lane.b32.xlu1 %v461_v19, %s2846_s8 }
 0x58a   :  { %v470_v20 = vpop.permute.xlu1 %469 }
 0x58b   :  { %2370 = vmatmul.mubr.msk.bf16.vlgmr.msra.gmra.mxu1 %vm236_vm2, %v470_v20  ;;  %2378 = vmatmul.mubr.msk.bf16.vlgmr.msra.gmra.mxu0 %vm236_vm2, %v470_v20 }
 0x58c   :  { %2382 = vmatpush3.bf16.msra.mxu1 %v2954_v8  ;;  %2385 = vmatprep.mubr.msk.bf16.mxu1 %vm2844_vm0, %v2843_v0 }
 0x58d   :  { %2383 = vmatprep.subr.bf16.mxu1 %v2843_v0  ;;  %2390 = vmatpush3.bf16.msra.mxu0 %v2991_v33 }
 0x58e   :  { %2391 = vmatprep.subr.bf16.mxu0 %v2843_v0  ;;  %2393 = vmatprep.mubr.msk.bf16.mxu0 %vm2844_vm0, %v2843_v0 }
 0x590   :  { %2384 = vmatpush3.bf16.msra.mxu1 %v2961_v9 }
 0x591   :  { %2392 = vmatpush3.bf16.msra.mxu0 %v3004_v37  ;;  %2397 = vmatprep.subr.bf16.mxu1 %v2843_v0 }
 0x592   :  { %2405 = vmatprep.subr.bf16.mxu0 %v2843_v0 }
 0x593   :  { %2386 = vmatmul.mubr.msk.bf16.vlgmr.msra.gmra.mxu1 %vm236_vm2, %v3019_v45 }
 0x594   :  { %2398 = vmatpush3.bf16.msra.mxu1 %v3052_v7  ;;  %2401 = vmatprep.mubr.msk.bf16.mxu1 %vm2844_vm0, %v2843_v0 }
 0x595   :  { %2399 = vmatprep.subr.bf16.mxu1 %v2843_v0 }
 0x598   :  { %2400 = vmatpush3.bf16.msra.mxu1 %v3055_v10 }
 0x599   :  { %2413 = vmatprep.subr.bf16.mxu1 %v2843_v0 }
 0x64b   :  { %v520_v22 = vpop.f32.mrf.mxu1  ;;  %v561_v23 = vpop.f32.mrf.mxu0 }
 0x64c   :  { %v521_v24 = vadd.f32 %v3091_v21, %v520_v22 }
 0x64d   :  { %v2371_v25 = vpop.f32.mrf.mxu1  ;;  %v2379_v26 = vpop.f32.mrf.mxu0 }
 0x64e   :  { %526 = vst [vmem:[#allocation8] sm:$0xff] %v521_v24 }
 0x64f   :  { %v523_v27 = vpop.f32.mrf.mxu1  ;;  %v564_v28 = vpop.f32.mrf.mxu0 }
 0x651   :  { %v2372_v29 = vpop.f32.mrf.mxu1  ;;  %v2380_v30 = vpop.f32.mrf.mxu0 }
 0x653   :  { %v601_v32 = vpop.f32.mrf.mxu1 }
 0x654   :  { %v607_v34 = vadd.f32 %v601_v32, %v175_v31 }
 0x655   :  { %v2387_v35 = vpop.f32.mrf.mxu1 }
 0x656   :  { %615 = vrot.lane.b32.xlu0 %v607_v34, %s2845_s26  ;;  %v2190_v39 = vmul.f32 -1.442695, %v607_v34 }
 0x657   :  { %v604_v36 = vpop.f32.mrf.mxu1 }
 0x658   :  { %2635 = vpow2.f32 %v2190_v39 }
 0x659   :  { %v2388_v38 = vpop.f32.mrf.mxu1 }
 0x665   :  { %v2636_v40 = vpop.eup %2635 }
 0x666   :  { %v611_v41 = vadd.f32 1.0, %v2636_v40  ;;  %v180_v40 = vadd.f32 %v2978_v13, %v2983_v15 }
 0x668   :  { %2637 = vrcp.f32 %v611_v41 }
 0x675   :  { %v2638_v42 = vpop.eup %2637 }
 0x676   :  { %v625_v55 = vsub.f32 1.0, %v2638_v42  ;;  %v631_v57 = vmul.f32 %v2638_v42, %v3014_v43 }
 0x6c8   :  { %v616_v44 = vpop.permute.xlu0 %615 }
 0x6c9   :  { %v618_v45 = vmul.f32 %v2638_v42, %v616_v44 }
 0x6cb   :  { %620 = vrot.lane.b32.xlu1 %v618_v45, %s2840_s22 }
 0x73d   :  { %v621_v53 = vpop.permute.xlu1 %620 }
 0x73e   :  { %v623_v54 = vadd.f32 %v621_v53, %v607_v34 }
 0x740   :  { %2639 = vtanh.f32 %v623_v54 }
 0x74d   :  { %v2640_v47 = vpop.eup %2639 }
 0x74e   :  { %627 = vrot.lane.b32.xlu0 %v2640_v47, %s2846_s8 }
 0x7c0   :  { %v628_v56 = vpop.permute.xlu0 %627 }
 0x7c1   :  { %v630_v58 = vmul.f32 %v628_v56, %v625_v55 }
 0x7c3   :  { %v3100_v59 = vadd.f32 %v631_v57, %v630_v58 }
 0x7c5   :  { %v633_v60 = vpack.c.bf16 %v3100_v59, %v3100_v59 }
 0x7c7   :  { %635 = vrot.lane.b32.xlu1 %v633_v60, %s2846_s8 }
 0x839   :  { %v636_v61 = vpop.permute.xlu1 %635 }
 0x83a   :  { %2394 = vmatmul.mubr.msk.bf16.vlgmr.msra.gmra.mxu0 %vm236_vm2, %v636_v61 }
 0x83b   :  { %2406 = vmatpush3.bf16.msra.mxu0 %v2929_v1  ;;  %2409 = vmatprep.mubr.msk.bf16.mxu0 %vm2844_vm0, %v2843_v0 }
 0x83c   :  { %2407 = vmatprep.subr.bf16.mxu0 %v2843_v0 }
 0x83f   :  { %2408 = vmatpush3.bf16.msra.mxu0 %v2932_v3 }
 0x840   :  { %2421 = vmatprep.subr.bf16.mxu0 %v2843_v0 }
 0x8fa   :  { %v674_v43 = vpop.f32.mrf.mxu0 }
 0x8fb   :  { %v675_v62 = vadd.f32 %v674_v43, %v561_v23 }
 0x8fc   :  { %v2395_v63 = vpop.f32.mrf.mxu0 }
 0x8fd   :  { %v680_v2 = vadd.f32 %v3044_v52, %v675_v62 }
 0x8fe   :  { %v677_v4 = vpop.f32.mrf.mxu0 }
 0x8ff   :  { %688 = vrot.lane.b32.xlu0 %v680_v2, %s2845_s26  ;;  %v2192_v11 = vmul.f32 -1.442695, %v680_v2 }
 0x900   :  { %v2396_v5 = vpop.f32.mrf.mxu0 }
 0x901   :  { %2641 = vpow2.f32 %v2192_v11 }
 0x90e   :  { %v2642_v12 = vpop.eup %2641 }
 0x90f   :  { %v684_v6 = vadd.f32 1.0, %v2642_v12 }
 0x911   :  { %2643 = vrcp.f32 %v684_v6 }
 0x91e   :  { %v2644_v14 = vpop.eup %2643 }
 0x91f   :  { %v698_v23 = vsub.f32 1.0, %v2644_v14  ;;  %v704_v25 = vmul.f32 %v2644_v14, %v3061_v18 }
 0x971   :  { %v689_v16 = vpop.permute.xlu0 %688 }
 0x972   :  { %v691_v17 = vmul.f32 %v2644_v14, %v689_v16 }
 0x974   :  { %693 = vrot.lane.b32.xlu1 %v691_v17, %s2840_s22 }
 0x9e6   :  { %v694_v19 = vpop.permute.xlu1 %693 }
 0x9e7   :  { %v696_v20 = vadd.f32 %v694_v19, %v680_v2 }
 0x9e9   :  { %2645 = vtanh.f32 %v696_v20 }
 0x9f6   :  { %v2646_v22 = vpop.eup %2645 }
 0x9f7   :  { %700 = vrot.lane.b32.xlu0 %v2646_v22, %s2846_s8 }
 0xa69   :  { %v701_v24 = vpop.permute.xlu0 %700 }
 0xa6a   :  { %v703_v26 = vmul.f32 %v701_v24, %v698_v23 }
 0xa6c   :  { %v3117_v27 = vadd.f32 %v704_v25, %v703_v26 }
 0xa6e   :  { %v706_v28 = vpack.c.bf16 %v3117_v27, %v3117_v27 }
 0xa70   :  { %708 = vrot.lane.b32.xlu1 %v706_v28, %s2846_s8 }
 0xae2   :  { %v709_v29 = vpop.permute.xlu1 %708 }
 0xae3   :  { %2402 = vmatmul.mubr.msk.bf16.vlgmr.msra.gmra.mxu1 %vm236_vm2, %v709_v29  ;;  %2410 = vmatmul.mubr.msk.bf16.vlgmr.msra.gmra.mxu0 %vm236_vm2, %v709_v29 }
 0xae4   :  { %2414 = vmatpush3.bf16.msra.mxu1 %v2954_v8  ;;  %2417 = vmatprep.mubr.msk.bf16.mxu1 %vm2844_vm0, %v2843_v0 }
 0xae5   :  { %2415 = vmatprep.subr.bf16.mxu1 %v2843_v0  ;;  %2422 = vmatpush3.bf16.msra.mxu0 %v2991_v33 }
 0xae6   :  { %2423 = vmatprep.subr.bf16.mxu0 %v2843_v0  ;;  %2425 = vmatprep.mubr.msk.bf16.mxu0 %vm2844_vm0, %v2843_v0 }
 0xae8   :  { %2416 = vmatpush3.bf16.msra.mxu1 %v2961_v9 }
 0xae9   :  { %2424 = vmatpush3.bf16.msra.mxu0 %v3004_v37  ;;  %2429 = vmatprep.subr.bf16.mxu1 %v2843_v0 }
 0xaea   :  { %2437 = vmatprep.subr.bf16.mxu0 %v2843_v0 }
 0xaeb   :  { %2418 = vmatmul.mubr.msk.bf16.vlgmr.msra.gmra.mxu1 %vm236_vm2, %v636_v61 }
 0xaec   :  { %2430 = vmatpush3.bf16.msra.mxu1 %v3052_v7  ;;  %2433 = vmatprep.mubr.msk.bf16.mxu1 %vm2844_vm0, %v2843_v0 }
 0xaed   :  { %2431 = vmatprep.subr.bf16.mxu1 %v2843_v0 }
 0xaf0   :  { %2432 = vmatpush3.bf16.msra.mxu1 %v3055_v10 }
 0xaf1   :  { %2445 = vmatprep.subr.bf16.mxu1 %v2843_v0 }
 0xba3   :  { %v747_v18 = vpop.f32.mrf.mxu1  ;;  %v788_v30 = vpop.f32.mrf.mxu0 }
 0xba4   :  { %v748_v31 = vadd.f32 %v3091_v21, %v747_v18 }
 0xba5   :  { %v2403_v32 = vpop.f32.mrf.mxu1  ;;  %v2411_v34 = vpop.f32.mrf.mxu0 }
 0xba6   :  { %753 = vst [vmem:[#allocation8 + $0x8] sm:$0xff] %v748_v31 }
 0xba7   :  { %v750_v35 = vpop.f32.mrf.mxu1  ;;  %v791_v36 = vpop.f32.mrf.mxu0 }
 0xba9   :  { %v2404_v38 = vpop.f32.mrf.mxu1  ;;  %v2412_v39 = vpop.f32.mrf.mxu0 }
 0xbab   :  { %v828_v41 = vpop.f32.mrf.mxu1 }
 0xbac   :  { %v834_v42 = vadd.f32 %v828_v41, %v180_v40 }
 0xbad   :  { %v2419_v44 = vpop.f32.mrf.mxu1 }
 0xbae   :  { %842 = vrot.lane.b32.xlu0 %v834_v42, %s2845_s26  ;;  %v2196_v54 = vmul.f32 -1.442695, %v834_v42 }
 0xbaf   :  { %v831_v45 = vpop.f32.mrf.mxu1 }
 0xbb0   :  { %2647 = vpow2.f32 %v2196_v54  ;;  %v183_v54 = vadd.f32 %v3029_v46, %v2983_v15 }
 0xbb1   :  { %v2420_v53 = vpop.f32.mrf.mxu1 }
 0xbbd   :  { %v2648_v47 = vpop.eup %2647 }
 0xbbe   :  { %v838_v55 = vadd.f32 1.0, %v2648_v47 }
 0xbc0   :  { %2649 = vrcp.f32 %v838_v55 }
 0xbcd   :  { %v2650_v56 = vpop.eup %2649 }
 0xbce   :  { %v852_v43 = vsub.f32 1.0, %v2650_v56  ;;  %v858_v63 = vmul.f32 %v2650_v56, %v3100_v59 }
 0xc20   :  { %v843_v57 = vpop.permute.xlu0 %842 }
 0xc21   :  { %v845_v58 = vmul.f32 %v2650_v56, %v843_v57 }
 0xc23   :  { %847 = vrot.lane.b32.xlu1 %v845_v58, %s2840_s22 }
 0xc95   :  { %v848_v60 = vpop.permute.xlu1 %847 }
 0xc96   :  { %v850_v61 = vadd.f32 %v848_v60, %v834_v42 }
 0xc98   :  { %2651 = vtanh.f32 %v850_v61 }
 0xca5   :  { %v2652_v13 = vpop.eup %2651 }
 0xca6   :  { %854 = vrot.lane.b32.xlu0 %v2652_v13, %s2846_s8 }
 0xd18   :  { %v855_v62 = vpop.permute.xlu0 %854 }
 0xd19   :  { %v857_v2 = vmul.f32 %v855_v62, %v852_v43 }
 0xd1b   :  { %v3150_v4 = vadd.f32 %v858_v63, %v857_v2 }
 0xd1d   :  { %v860_v5 = vpack.c.bf16 %v3150_v4, %v3150_v4 }
 0xd1f   :  { %862 = vrot.lane.b32.xlu1 %v860_v5, %s2846_s8 }
 0xd91   :  { %v863_v11 = vpop.permute.xlu1 %862 }
 0xd92   :  { %2426 = vmatmul.mubr.msk.bf16.vlgmr.msra.gmra.mxu0 %vm236_vm2, %v863_v11 }
 0xd93   :  { %2438 = vmatpush3.bf16.msra.mxu0 %v2929_v1  ;;  %2441 = vmatprep.mubr.msk.bf16.mxu0 %vm2844_vm0, %v2843_v0 }
 0xd94   :  { %2439 = vmatprep.subr.bf16.mxu0 %v2843_v0 }
 0xd97   :  { %2440 = vmatpush3.bf16.msra.mxu0 %v2932_v3 }
 0xd98   :  { %2453 = vmatprep.subr.bf16.mxu0 %v2843_v0 }
 0xe52   :  { %v901_v59 = vpop.f32.mrf.mxu0 }
 0xe53   :  { %v902_v12 = vadd.f32 %v901_v59, %v788_v30 }
 0xe54   :  { %v2427_v6 = vpop.f32.mrf.mxu0 }
 0xe55   :  { %v907_v14 = vadd.f32 %v3044_v52, %v902_v12 }
 0xe56   :  { %v904_v16 = vpop.f32.mrf.mxu0 }
 0xe57   :  { %915 = vrot.lane.b32.xlu0 %v907_v14, %s2845_s26  ;;  %v2198_v19 = vmul.f32 -1.442695, %v907_v14 }
 0xe58   :  { %v2428_v17 = vpop.f32.mrf.mxu0 }
 0xe59   :  { %2653 = vpow2.f32 %v2198_v19 }
 0xe66   :  { %v2654_v20 = vpop.eup %2653 }
 0xe67   :  { %v911_v22 = vadd.f32 1.0, %v2654_v20 }
 0xe69   :  { %2655 = vrcp.f32 %v911_v22 }
 0xe76   :  { %v2656_v23 = vpop.eup %2655 }
 0xe77   :  { %v925_v18 = vsub.f32 1.0, %v2656_v23  ;;  %v931_v31 = vmul.f32 %v2656_v23, %v3117_v27 }
 0xec9   :  { %v916_v24 = vpop.permute.xlu0 %915 }
 0xeca   :  { %v918_v25 = vmul.f32 %v2656_v23, %v916_v24 }
 0xecc   :  { %920 = vrot.lane.b32.xlu1 %v918_v25, %s2840_s22 }
 0xf3e   :  { %v921_v26 = vpop.permute.xlu1 %920 }
 0xf3f   :  { %v923_v28 = vadd.f32 %v921_v26, %v907_v14 }
 0xf41   :  { %2657 = vtanh.f32 %v923_v28 }
 0xf4e   :  { %v2658_v29 = vpop.eup %2657 }
 0xf4f   :  { %927 = vrot.lane.b32.xlu0 %v2658_v29, %s2846_s8 }
 0xfc1   :  { %v928_v30 = vpop.permute.xlu0 %927 }
 0xfc2   :  { %v930_v32 = vmul.f32 %v928_v30, %v925_v18 }
 0xfc4   :  { %v3167_v34 = vadd.f32 %v931_v31, %v930_v32 }
 0xfc6   :  { %v933_v35 = vpack.c.bf16 %v3167_v34, %v3167_v34 }
 0xfc8   :  { %935 = vrot.lane.b32.xlu1 %v933_v35, %s2846_s8 }
0x103a   :  { %v936_v36 = vpop.permute.xlu1 %935 }
0x103b   :  { %2434 = vmatmul.mubr.msk.bf16.vlgmr.msra.gmra.mxu1 %vm236_vm2, %v936_v36  ;;  %2442 = vmatmul.mubr.msk.bf16.vlgmr.msra.gmra.mxu0 %vm236_vm2, %v936_v36 }
0x103c   :  { %2446 = vmatpush3.bf16.msra.mxu1 %v2954_v8  ;;  %2449 = vmatprep.mubr.msk.bf16.mxu1 %vm2844_vm0, %v2843_v0 }
0x103d   :  { %2447 = vmatprep.subr.bf16.mxu1 %v2843_v0  ;;  %2454 = vmatpush3.bf16.msra.mxu0 %v2991_v33 }
0x103e   :  { %2455 = vmatprep.subr.bf16.mxu0 %v2843_v0  ;;  %2457 = vmatprep.mubr.msk.bf16.mxu0 %vm2844_vm0, %v2843_v0 }
0x1040   :  { %2448 = vmatpush3.bf16.msra.mxu1 %v2961_v9 }
0x1041   :  { %2456 = vmatpush3.bf16.msra.mxu0 %v3004_v37  ;;  %2461 = vmatprep.subr.bf16.mxu1 %v2843_v0 }
0x1042   :  { %2469 = vmatprep.subr.bf16.mxu0 %v2843_v0 }
0x1043   :  { %2450 = vmatmul.mubr.msk.bf16.vlgmr.msra.gmra.mxu1 %vm236_vm2, %v863_v11 }
0x1044   :  { %2462 = vmatpush3.bf16.msra.mxu1 %v3052_v7  ;;  %2465 = vmatprep.mubr.msk.bf16.mxu1 %vm2844_vm0, %v2843_v0 }
0x1045   :  { %2463 = vmatprep.subr.bf16.mxu1 %v2843_v0 }
0x1048   :  { %2464 = vmatpush3.bf16.msra.mxu1 %v3055_v10 }
0x1049   :  { %2477 = vmatprep.subr.bf16.mxu1 %v2843_v0 }
0x10fb   :  { %v974_v27 = vpop.f32.mrf.mxu1  ;;  %v1015_v38 = vpop.f32.mrf.mxu0 }
0x10fc   :  { %v975_v39 = vadd.f32 %v3091_v21, %v974_v27 }
0x10fd   :  { %v2435_v40 = vpop.f32.mrf.mxu1  ;;  %v2443_v41 = vpop.f32.mrf.mxu0 }
0x10fe   :  { %980 = vst [vmem:[#allocation8 + $0x10] sm:$0xff] %v975_v39 }
0x10ff   :  { %v977_v42 = vpop.f32.mrf.mxu1  ;;  %v1018_v44 = vpop.f32.mrf.mxu0 }
0x1101   :  { %v2436_v45 = vpop.f32.mrf.mxu1  ;;  %v2444_v53 = vpop.f32.mrf.mxu0 }
0x1103   :  { %v1055_v47 = vpop.f32.mrf.mxu1 }
0x1104   :  { %v1061_v55 = vadd.f32 %v1055_v47, %v183_v54 }
0x1105   :  { %v2451_v56 = vpop.f32.mrf.mxu1 }
0x1106   :  { %1069 = vrot.lane.b32.xlu0 %v1061_v55, %s2845_s26  ;;  %v2202_v60 = vmul.f32 -1.442695, %v1061_v55 }
0x1107   :  { %v1058_v57 = vpop.f32.mrf.mxu1 }
0x1108   :  { %2659 = vpow2.f32 %v2202_v60 }
0x1109   :  { %v2452_v58 = vpop.f32.mrf.mxu1 }
0x110a   :  { %v188_v58 = vadd.f32 %v2983_v15, %v3035_v49 }
0x1115   :  { %v2660_v61 = vpop.eup %2659 }
0x1116   :  { %v1065_v13 = vadd.f32 1.0, %v2660_v61 }
0x1118   :  { %2661 = vrcp.f32 %v1065_v13 }
0x1125   :  { %v2662_v43 = vpop.eup %2661 }
0x1126   :  { %v1079_v11 = vsub.f32 1.0, %v2662_v43  ;;  %v1085_v12 = vmul.f32 %v2662_v43, %v3150_v4 }
0x1178   :  { %v1070_v62 = vpop.permute.xlu0 %1069 }
0x1179   :  { %v1072_v63 = vmul.f32 %v2662_v43, %v1070_v62 }
0x117b   :  { %1074 = vrot.lane.b32.xlu1 %v1072_v63, %s2840_s22 }
0x11ed   :  { %v1075_v2 = vpop.permute.xlu1 %1074 }
0x11ee   :  { %v1077_v5 = vadd.f32 %v1075_v2, %v1061_v55 }
0x11f0   :  { %2663 = vtanh.f32 %v1077_v5 }
0x11fd   :  { %v2664_v46 = vpop.eup %2663 }
0x11fe   :  { %1081 = vrot.lane.b32.xlu0 %v2664_v46, %s2846_s8 }
0x1270   :  { %v1082_v59 = vpop.permute.xlu0 %1081 }
0x1271   :  { %v1084_v6 = vmul.f32 %v1082_v59, %v1079_v11 }
0x1273   :  { %v3200_v14 = vadd.f32 %v1085_v12, %v1084_v6 }
0x1275   :  { %v1087_v16 = vpack.c.bf16 %v3200_v14, %v3200_v14 }
0x1277   :  { %1089 = vrot.lane.b32.xlu1 %v1087_v16, %s2846_s8 }
0x12e9   :  { %v1090_v17 = vpop.permute.xlu1 %1089 }
0x12ea   :  { %2458 = vmatmul.mubr.msk.bf16.vlgmr.msra.gmra.mxu0 %vm236_vm2, %v1090_v17 }
0x12eb   :  { %2470 = vmatpush3.bf16.msra.mxu0 %v2929_v1  ;;  %2473 = vmatprep.mubr.msk.bf16.mxu0 %vm2844_vm0, %v2843_v0 }
0x12ec   :  { %2471 = vmatprep.subr.bf16.mxu0 %v2843_v0 }
0x12ef   :  { %2472 = vmatpush3.bf16.msra.mxu0 %v2932_v3 }
0x12f0   :  { %2485 = vmatprep.subr.bf16.mxu0 %v2843_v0 }
0x13aa   :  { %v1128_v4 = vpop.f32.mrf.mxu0 }
0x13ab   :  { %v1129_v19 = vadd.f32 %v1128_v4, %v1015_v38 }
0x13ac   :  { %v2459_v20 = vpop.f32.mrf.mxu0 }
0x13ad   :  { %v1134_v22 = vadd.f32 %v3044_v52, %v1129_v19 }
0x13ae   :  { %v1131_v23 = vpop.f32.mrf.mxu0 }
0x13af   :  { %1142 = vrot.lane.b32.xlu0 %v1134_v22, %s2845_s26  ;;  %v2204_v25 = vmul.f32 -1.442695, %v1134_v22 }
0x13b0   :  { %v2460_v24 = vpop.f32.mrf.mxu0 }
0x13b1   :  { %2665 = vpow2.f32 %v2204_v25 }
0x13be   :  { %v2666_v26 = vpop.eup %2665 }
0x13bf   :  { %v1138_v28 = vadd.f32 1.0, %v2666_v26 }
0x13c1   :  { %2667 = vrcp.f32 %v1138_v28 }
0x13ce   :  { %v2668_v29 = vpop.eup %2667 }
0x13cf   :  { %v1152_v36 = vsub.f32 1.0, %v2668_v29  ;;  %v1158_v38 = vmul.f32 %v2668_v29, %v3167_v34 }
0x1421   :  { %v1143_v18 = vpop.permute.xlu0 %1142 }
0x1422   :  { %v1145_v30 = vmul.f32 %v2668_v29, %v1143_v18 }
0x1424   :  { %1147 = vrot.lane.b32.xlu1 %v1145_v30, %s2840_s22 }
0x1496   :  { %v1148_v31 = vpop.permute.xlu1 %1147 }
0x1497   :  { %v1150_v32 = vadd.f32 %v1148_v31, %v1134_v22 }
0x1499   :  { %2669 = vtanh.f32 %v1150_v32 }
0x14a6   :  { %v2670_v35 = vpop.eup %2669 }
0x14a7   :  { %1154 = vrot.lane.b32.xlu0 %v2670_v35, %s2846_s8 }
0x1519   :  { %v1155_v27 = vpop.permute.xlu0 %1154 }
0x151a   :  { %v1157_v39 = vmul.f32 %v1155_v27, %v1152_v36 }
0x151c   :  { %v3217_v40 = vadd.f32 %v1158_v38, %v1157_v39 }
0x151e   :  { %v1160_v41 = vpack.c.bf16 %v3217_v40, %v3217_v40 }
0x1520   :  { %1162 = vrot.lane.b32.xlu1 %v1160_v41, %s2846_s8 }
0x1592   :  { %v1163_v42 = vpop.permute.xlu1 %1162 }
0x1593   :  { %2466 = vmatmul.mubr.msk.bf16.vlgmr.msra.gmra.mxu1 %vm236_vm2, %v1163_v42  ;;  %2474 = vmatmul.mubr.msk.bf16.vlgmr.msra.gmra.mxu0 %vm236_vm2, %v1163_v42 }
0x1594   :  { %2478 = vmatpush3.bf16.msra.mxu1 %v2954_v8  ;;  %2481 = vmatprep.mubr.msk.bf16.mxu1 %vm2844_vm0, %v2843_v0 }
0x1595   :  { %2479 = vmatprep.subr.bf16.mxu1 %v2843_v0  ;;  %2486 = vmatpush3.bf16.msra.mxu0 %v2991_v33 }
0x1596   :  { %2487 = vmatprep.subr.bf16.mxu0 %v2843_v0  ;;  %2489 = vmatprep.mubr.msk.bf16.mxu0 %vm2844_vm0, %v2843_v0 }
0x1598   :  { %2480 = vmatpush3.bf16.msra.mxu1 %v2961_v9 }
0x1599   :  { %2488 = vmatpush3.bf16.msra.mxu0 %v3004_v37  ;;  %2493 = vmatprep.subr.bf16.mxu1 %v2843_v0 }
0x159a   :  { %2501 = vmatprep.subr.bf16.mxu0 %v2843_v0 }
0x159b   :  { %2482 = vmatmul.mubr.msk.bf16.vlgmr.msra.gmra.mxu1 %vm236_vm2, %v1090_v17 }
0x159c   :  { %2494 = vmatpush3.bf16.msra.mxu1 %v3052_v7  ;;  %2497 = vmatprep.mubr.msk.bf16.mxu1 %vm2844_vm0, %v2843_v0 }
0x159d   :  { %2495 = vmatprep.subr.bf16.mxu1 %v2843_v0 }
0x15a0   :  { %2496 = vmatpush3.bf16.msra.mxu1 %v3055_v10 }
0x15a1   :  { %2509 = vmatprep.subr.bf16.mxu1 %v2843_v0 }
0x1653   :  { %v1201_v34 = vpop.f32.mrf.mxu1  ;;  %v1242_v44 = vpop.f32.mrf.mxu0 }
0x1654   :  { %v1202_v45 = vadd.f32 %v3091_v21, %v1201_v34 }
0x1655   :  { %v2467_v53 = vpop.f32.mrf.mxu1  ;;  %v2475_v54 = vpop.f32.mrf.mxu0 }
0x1656   :  { %1207 = vst [vmem:[#allocation8 + $0x18] sm:$0xff] %v1202_v45 }
0x1657   :  { %v1204_v47 = vpop.f32.mrf.mxu1  ;;  %v1245_v55 = vpop.f32.mrf.mxu0 }
0x1659   :  { %v2468_v56 = vpop.f32.mrf.mxu1  ;;  %v2476_v57 = vpop.f32.mrf.mxu0 }
0x165a   :  { %v191_v56 = vadd.f32 %v2983_v15, %v3039_v51 }
0x165b   :  { %v1282_v60 = vpop.f32.mrf.mxu1 }
0x165c   :  { %v1288_v61 = vadd.f32 %v1282_v60, %v188_v58 }
0x165d   :  { %v2483_v13 = vpop.f32.mrf.mxu1 }
0x165e   :  { %1296 = vrot.lane.b32.xlu0 %v1288_v61, %s2845_s26  ;;  %v2208_v63 = vmul.f32 -1.442695, %v1288_v61 }
0x165f   :  { %v1285_v43 = vpop.f32.mrf.mxu1 }
0x1660   :  { %2671 = vpow2.f32 %v2208_v63 }
0x1661   :  { %v2484_v62 = vpop.f32.mrf.mxu1 }
0x166d   :  { %v2672_v2 = vpop.eup %2671 }
0x166e   :  { %v1292_v5 = vadd.f32 1.0, %v2672_v2 }
0x1670   :  { %2673 = vrcp.f32 %v1292_v5 }
0x167d   :  { %v2674_v46 = vpop.eup %2673 }
0x167e   :  { %v1306_v16 = vsub.f32 1.0, %v2674_v46  ;;  %v1312_v4 = vmul.f32 %v2674_v46, %v3200_v14 }
0x16d0   :  { %v1297_v11 = vpop.permute.xlu0 %1296 }
0x16d1   :  { %v1299_v59 = vmul.f32 %v2674_v46, %v1297_v11 }
0x16d3   :  { %1301 = vrot.lane.b32.xlu1 %v1299_v59, %s2840_s22 }
0x1745   :  { %v1302_v12 = vpop.permute.xlu1 %1301 }
0x1746   :  { %v1304_v6 = vadd.f32 %v1302_v12, %v1288_v61 }
0x1748   :  { %2675 = vtanh.f32 %v1304_v6 }
0x1755   :  { %v2676_v49 = vpop.eup %2675 }
0x1756   :  { %1308 = vrot.lane.b32.xlu0 %v2676_v49, %s2846_s8 }
0x17c8   :  { %v1309_v17 = vpop.permute.xlu0 %1308 }
0x17c9   :  { %v1311_v19 = vmul.f32 %v1309_v17, %v1306_v16 }
0x17cb   :  { %v3250_v20 = vadd.f32 %v1312_v4, %v1311_v19  ;;  %v3306_v19 = vld [vmem:[#allocation5 + $0x8] sm:$0xff]  }
0x17cd   :  { %v1314_v22 = vpack.c.bf16 %v3250_v20, %v3250_v20 }
0x17cf   :  { %1316 = vrot.lane.b32.xlu1 %v1314_v22, %s2846_s8 }
0x1841   :  { %v1317_v23 = vpop.permute.xlu1 %1316 }
0x1842   :  { %2490 = vmatmul.mubr.msk.bf16.vlgmr.msra.gmra.mxu0 %vm236_vm2, %v1317_v23 }
0x1843   :  { %2502 = vmatpush3.bf16.msra.mxu0 %v2929_v1  ;;  %2505 = vmatprep.mubr.msk.bf16.mxu0 %vm2844_vm0, %v2843_v0 }
0x1844   :  { %2503 = vmatprep.subr.bf16.mxu0 %v2843_v0 }
0x1847   :  { %2504 = vmatpush3.bf16.msra.mxu0 %v2932_v3 }
0x1848   :  { %2517 = vmatprep.subr.bf16.mxu0 %v2843_v0 }
0x1902   :  { %v1355_v14 = vpop.f32.mrf.mxu0 }
0x1903   :  { %v1356_v24 = vadd.f32 %v1355_v14, %v1242_v44 }
0x1904   :  { %v2491_v25 = vpop.f32.mrf.mxu0 }
0x1905   :  { %v1361_v26 = vadd.f32 %v3044_v52, %v1356_v24 }
0x1906   :  { %v1358_v28 = vpop.f32.mrf.mxu0 }
0x1907   :  { %1369 = vrot.lane.b32.xlu0 %v1361_v26, %s2845_s26  ;;  %v2210_v18 = vmul.f32 -1.442695, %v1361_v26 }
0x1908   :  { %v2492_v29 = vpop.f32.mrf.mxu0 }
0x1909   :  { %2677 = vpow2.f32 %v2210_v18 }
0x1916   :  { %v2678_v1 = vpop.eup %2677 }
0x1917   :  { %v1365_v30 = vadd.f32 1.0, %v2678_v1 }
0x1919   :  { %2679 = vrcp.f32 %v1365_v30 }
0x1926   :  { %v2680_v31 = vpop.eup %2679 }
0x1927   :  { %v1379_v38 = vsub.f32 1.0, %v2680_v31  ;;  %v1385_v41 = vmul.f32 %v2680_v31, %v3217_v40 }
0x1979   :  { %v1370_v32 = vpop.permute.xlu0 %1369 }
0x197a   :  { %v1372_v35 = vmul.f32 %v2680_v31, %v1370_v32 }
0x197c   :  { %1374 = vrot.lane.b32.xlu1 %v1372_v35, %s2840_s22 }
0x19ee   :  { %v1375_v3 = vpop.permute.xlu1 %1374 }
0x19ef   :  { %v1377_v36 = vadd.f32 %v1375_v3, %v1361_v26 }
0x19f1   :  { %2681 = vtanh.f32 %v1377_v36 }
0x19fe   :  { %v2682_v27 = vpop.eup %2681 }
0x19ff   :  { %1381 = vrot.lane.b32.xlu0 %v2682_v27, %s2846_s8 }
0x1a71   :  { %v1382_v39 = vpop.permute.xlu0 %1381 }
0x1a72   :  { %v1384_v42 = vmul.f32 %v1382_v39, %v1379_v38 }
0x1a74   :  { %v3267_v34 = vadd.f32 %v1385_v41, %v1384_v42 }
0x1a76   :  { %v1387_v44 = vpack.c.bf16 %v3267_v34, %v3267_v34 }
0x1a78   :  { %1389 = vrot.lane.b32.xlu1 %v1387_v44, %s2846_s8  ;;  %v3331_v44 = vld [vmem:[%s3459_s4 + $0x8] sm:$0xff]  }
0x1aea   :  { %v1390_v45 = vpop.permute.xlu1 %1389 }
0x1aeb   :  { %2498 = vmatmul.mubr.msk.bf16.vlgmr.msra.gmra.mxu1 %vm236_vm2, %v1390_v45  ;;  %2506 = vmatmul.mubr.msk.bf16.vlgmr.msra.gmra.mxu0 %vm236_vm2, %v1390_v45  ;;  %v3349_v45 = vld [vmem:[%s3459_s4] sm:$0xff]  }
0x1aec   :  { %2510 = vmatpush3.bf16.msra.mxu1 %v2954_v8  ;;  %2513 = vmatprep.mubr.msk.bf16.mxu1 %vm2844_vm0, %v2843_v0 }
0x1aed   :  { %2511 = vmatprep.subr.bf16.mxu1 %v2843_v0  ;;  %2518 = vmatpush3.bf16.msra.mxu0 %v2991_v33 }
0x1aee   :  { %2519 = vmatprep.subr.bf16.mxu0 %v2843_v0  ;;  %2521 = vmatprep.mubr.msk.bf16.mxu0 %vm2844_vm0, %v2843_v0 }
0x1af0   :  { %2512 = vmatpush3.bf16.msra.mxu1 %v2961_v9 }
0x1af1   :  { %2520 = vmatpush3.bf16.msra.mxu0 %v3004_v37  ;;  %2525 = vmatprep.subr.bf16.mxu1 %v2843_v0 }
0x1af2   :  { %2533 = vmatprep.subr.bf16.mxu0 %v2843_v0 }
0x1af3   :  { %2514 = vmatmul.mubr.msk.bf16.vlgmr.msra.gmra.mxu1 %vm236_vm2, %v1317_v23 }
0x1af4   :  { %2526 = vmatpush3.bf16.msra.mxu1 %v3052_v7  ;;  %2529 = vmatprep.mubr.msk.bf16.mxu1 %vm2844_vm0, %v2843_v0 }
0x1af5   :  { %2527 = vmatprep.subr.bf16.mxu1 %v2843_v0 }
0x1af8   :  { %2528 = vmatpush3.bf16.msra.mxu1 %v3055_v10 }
0x1af9   :  { %2541 = vmatprep.subr.bf16.mxu1 %v2843_v0 }
0x1bab   :  { %v1428_v8 = vpop.f32.mrf.mxu1  ;;  %v1469_v9 = vpop.f32.mrf.mxu0 }
0x1bac   :  { %v1429_v33 = vadd.f32 %v3091_v21, %v1428_v8  ;;  %v3355_v8 = vld [vmem:[%s3460_s5] sm:$0xff]  }
0x1bad   :  { %v2499_v37 = vpop.f32.mrf.mxu1  ;;  %v2507_v40 = vpop.f32.mrf.mxu0 }
0x1bae   :  { %1434 = vst [vmem:[#allocation8 + $0x20] sm:$0xff] %v1429_v33 }
0x1baf   :  { %v1431_v53 = vpop.f32.mrf.mxu1  ;;  %v1472_v54 = vpop.f32.mrf.mxu0 }
0x1bb1   :  { %v2500_v47 = vpop.f32.mrf.mxu1  ;;  %v2508_v55 = vpop.f32.mrf.mxu0 }
0x1bb3   :  { %v1509_v57 = vpop.f32.mrf.mxu1 }
0x1bb4   :  { %v1515_v58 = vadd.f32 %v1509_v57, %v191_v56  ;;  %v3371_v56 = vld [vmem:[%s3458_s3] ss:$0 sm:$0xff] }
0x1bb5   :  { %v2515_v60 = vpop.f32.mrf.mxu1 }
0x1bb6   :  { %1523 = vrot.lane.b32.xlu0 %v1515_v58, %s2845_s26  ;;  %v2214_v43 = vmul.f32 -1.442695, %v1515_v58 }
0x1bb7   :  { %v1512_v61 = vpop.f32.mrf.mxu1 }
0x1bb8   :  { %2683 = vpow2.f32 %v2214_v43 }
0x1bb9   :  { %v2516_v13 = vpop.f32.mrf.mxu1 }
0x1bc5   :  { %v2684_v62 = vpop.eup %2683 }
0x1bc6   :  { %v1519_v63 = vadd.f32 1.0, %v2684_v62 }
0x1bc8   :  { %2685 = vrcp.f32 %v1519_v63 }
0x1bd5   :  { %v2686_v2 = vpop.eup %2685 }
0x1bd6   :  { %v1533_v51 = vsub.f32 1.0, %v2686_v2  ;;  %v1539_v6 = vmul.f32 %v2686_v2, %v3250_v20  ;;  %v3312_v20 = vld [vmem:[#allocation5] sm:$0xff]  }
0x1c28   :  { %v1524_v5 = vpop.permute.xlu0 %1523 }
0x1c29   :  { %v1526_v46 = vmul.f32 %v2686_v2, %v1524_v5 }
0x1c2b   :  { %1528 = vrot.lane.b32.xlu1 %v1526_v46, %s2840_s22 }
0x1c9d   :  { %v1529_v11 = vpop.permute.xlu1 %1528 }
0x1c9e   :  { %v1531_v59 = vadd.f32 %v1529_v11, %v1515_v58 }
0x1ca0   :  { %2687 = vtanh.f32 %v1531_v59 }
0x1cad   :  { %v2688_v15 = vpop.eup %2687 }
0x1cae   :  { %1535 = vrot.lane.b32.xlu0 %v2688_v15, %s2846_s8 }
0x1d20   :  { %v1536_v12 = vpop.permute.xlu0 %1535 }
0x1d21   :  { %v1538_v49 = vmul.f32 %v1536_v12, %v1533_v51 }
0x1d23   :  { %v3300_v16 = vadd.f32 %v1539_v6, %v1538_v49 }
0x1d25   :  { %v1541_v17 = vpack.c.bf16 %v3300_v16, %v3300_v16 }
0x1d27   :  { %1543 = vrot.lane.b32.xlu1 %v1541_v17, %s2846_s8 }
0x1d99   :  { %v1544_v4 = vpop.permute.xlu1 %1543 }
0x1d9a   :  { %2522 = vmatmul.mubr.msk.bf16.vlgmr.msra.gmra.mxu0 %vm236_vm2, %v1544_v4 }
0x1d9b   :  { %2534 = vmatpush3.bf16.msra.mxu0 %v3306_v19  ;;  %2537 = vmatprep.mubr.msk.bf16.mxu0 %vm2844_vm0, %v2843_v0 }
0x1d9c   :  { %2535 = vmatprep.subr.bf16.mxu0 %v2843_v0 }
0x1d9f   :  { %2536 = vmatpush3.bf16.msra.mxu0 %v3312_v20 }
0x1da0   :  { %2549 = vmatprep.subr.bf16.mxu0 %v2843_v0 }
0x1e5a   :  { %v1582_v22 = vpop.f32.mrf.mxu0 }
0x1e5b   :  { %v1583_v23 = vadd.f32 %v1582_v22, %v1469_v9 }
0x1e5c   :  { %v2523_v14 = vpop.f32.mrf.mxu0 }
0x1e5d   :  { %v1588_v24 = vadd.f32 %v3044_v52, %v1583_v23  ;;  %v3394_v23 = vld [vmem:[%s3462_s7] ss:$0 sm:$0xff] }
0x1e5e   :  { %v1585_v25 = vpop.f32.mrf.mxu0 }
0x1e5f   :  { %1596 = vrot.lane.b32.xlu0 %v1588_v24, %s2845_s26  ;;  %v2216_v28 = vmul.f32 -1.442695, %v1588_v24 }
0x1e60   :  { %v2524_v26 = vpop.f32.mrf.mxu0 }
0x1e61   :  { %2689 = vpow2.f32 %v2216_v28 }
0x1e6e   :  { %v2690_v29 = vpop.eup %2689 }
0x1e6f   :  { %v1592_v18 = vadd.f32 1.0, %v2690_v29 }
0x1e71   :  { %2691 = vrcp.f32 %v1592_v18 }
0x1e7e   :  { %v2692_v1 = vpop.eup %2691 }
0x1e7f   :  { %v1606_v52 = vsub.f32 1.0, %v2692_v1  ;;  %v1612_v27 = vmul.f32 %v2692_v1, %v3267_v34  ;;  %v3340_v34 = vld [vmem:[%s3460_s5 + $0x8] sm:$0xff]  }
0x1ed1   :  { %v1597_v30 = vpop.permute.xlu0 %1596 }
0x1ed2   :  { %v1599_v31 = vmul.f32 %v2692_v1, %v1597_v30 }
0x1ed4   :  { %1601 = vrot.lane.b32.xlu1 %v1599_v31, %s2840_s22 }
0x1f46   :  { %v1602_v32 = vpop.permute.xlu1 %1601 }
0x1f47   :  { %v1604_v35 = vadd.f32 %v1602_v32, %v1588_v24 }
0x1f49   :  { %2693 = vtanh.f32 %v1604_v35 }
0x1f56   :  { %v2694_v3 = vpop.eup %2693 }
0x1f57   :  { %1608 = vrot.lane.b32.xlu0 %v2694_v3, %s2846_s8 }
0x1fc9   :  { %v1609_v36 = vpop.permute.xlu0 %1608 }
0x1fca   :  { %v1611_v38 = vmul.f32 %v1609_v36, %v1606_v52 }
0x1fcc   :  { %v3321_v39 = vadd.f32 %v1612_v27, %v1611_v38 }
0x1fce   :  { %v1614_v41 = vpack.c.bf16 %v3321_v39, %v3321_v39 }
0x1fd0   :  { %1616 = vrot.lane.b32.xlu1 %v1614_v41, %s2846_s8  ;;  %v2728_v41 = vld [vmem:[#allocation7] sm:$0xff]  }
0x2042   :  { %v1617_v42 = vpop.permute.xlu1 %1616 }
0x2043   :  { %2530 = vmatmul.mubr.msk.bf16.vlgmr.msra.gmra.mxu1 %vm236_vm2, %v1617_v42  ;;  %2538 = vmatmul.mubr.msk.bf16.vlgmr.msra.gmra.mxu0 %vm236_vm2, %v1617_v42 }
0x2044   :  { %2542 = vmatpush3.bf16.msra.mxu1 %v3331_v44  ;;  %2545 = vmatprep.mubr.msk.bf16.mxu1 %vm2844_vm0, %v2843_v0 }
0x2045   :  { %2543 = vmatprep.subr.bf16.mxu1 %v2843_v0  ;;  %2550 = vmatpush3.bf16.msra.mxu0 %v3340_v34 }
0x2046   :  { %2551 = vmatprep.subr.bf16.mxu0 %v2843_v0  ;;  %2553 = vmatprep.mubr.msk.bf16.mxu0 %vm2844_vm0, %v2843_v0 }
0x2048   :  { %2544 = vmatpush3.bf16.msra.mxu1 %v3349_v45 }
0x2049   :  { %2552 = vmatpush3.bf16.msra.mxu0 %v3355_v8  ;;  %2557 = vmatprep.subr.bf16.mxu1 %v2843_v0 }
0x204a   :  { %2565 = vmatprep.subr.bf16.mxu0 %v2843_v0 }
0x204b   :  { %2546 = vmatmul.mubr.msk.bf16.vlgmr.msra.gmra.mxu1 %vm236_vm2, %v1544_v4 }
0x204c   :  { %2558 = vmatpush3.bf16.msra.mxu1 %v3052_v7  ;;  %2561 = vmatprep.mubr.msk.bf16.mxu1 %vm2844_vm0, %v2843_v0 }
0x204d   :  { %2559 = vmatprep.subr.bf16.mxu1 %v2843_v0 }
0x2050   :  { %2560 = vmatpush3.bf16.msra.mxu1 %v3055_v10  ;;  %v196_v10 = vadd.f32 %v3371_v56, %v3033_v48 }
0x2051   :  { %2573 = vmatprep.subr.bf16.mxu1 %v2843_v0 }
0x2103   :  { %v1655_v9 = vpop.f32.mrf.mxu1  ;;  %v1696_v33 = vpop.f32.mrf.mxu0 }
0x2104   :  { %v1656_v37 = vadd.f32 %v3091_v21, %v1655_v9 }
0x2105   :  { %v2531_v40 = vpop.f32.mrf.mxu1  ;;  %v2539_v53 = vpop.f32.mrf.mxu0 }
0x2106   :  { %1661 = vst [vmem:[#allocation8 + $0x28] sm:$0xff] %v1656_v37 }
0x2107   :  { %v1658_v54 = vpop.f32.mrf.mxu1  ;;  %v1699_v47 = vpop.f32.mrf.mxu0 }
0x2109   :  { %v2532_v55 = vpop.f32.mrf.mxu1  ;;  %v2540_v7 = vpop.f32.mrf.mxu0 }
0x210b   :  { %v1736_v57 = vpop.f32.mrf.mxu1 }
0x210c   :  { %v1742_v58 = vadd.f32 %v1736_v57, %v196_v10 }
0x210d   :  { %v2547_v60 = vpop.f32.mrf.mxu1 }
0x210e   :  { %1750 = vrot.lane.b32.xlu0 %v1742_v58, %s2845_s26  ;;  %v2220_v13 = vmul.f32 -1.442695, %v1742_v58 }
0x210f   :  { %v1739_v21 = vpop.f32.mrf.mxu1 }
0x2110   :  { %2695 = vpow2.f32 %v2220_v13 }
0x2111   :  { %v2548_v61 = vpop.f32.mrf.mxu1 }
0x211d   :  { %v2696_v43 = vpop.eup %2695 }
0x211e   :  { %v1746_v62 = vadd.f32 1.0, %v2696_v43 }
0x2120   :  { %2697 = vrcp.f32 %v1746_v62 }
0x212d   :  { %v2698_v63 = vpop.eup %2697 }
0x212e   :  { %v1760_v59 = vsub.f32 1.0, %v2698_v63  ;;  %v1766_v51 = vmul.f32 %v2698_v63, %v3300_v16 }
0x2180   :  { %v1751_v2 = vpop.permute.xlu0 %1750 }
0x2181   :  { %v1753_v5 = vmul.f32 %v2698_v63, %v1751_v2 }
0x2183   :  { %1755 = vrot.lane.b32.xlu1 %v1753_v5, %s2840_s22 }
0x21f5   :  { %v1756_v46 = vpop.permute.xlu1 %1755 }
0x21f6   :  { %v1758_v11 = vadd.f32 %v1756_v46, %v1742_v58 }
0x21f8   :  { %2699 = vtanh.f32 %v1758_v11 }
0x2205   :  { %v2700_v48 = vpop.eup %2699 }
0x2206   :  { %1762 = vrot.lane.b32.xlu0 %v2700_v48, %s2846_s8 }
0x2278   :  { %v1763_v15 = vpop.permute.xlu0 %1762 }
0x2279   :  { %v1765_v12 = vmul.f32 %v1763_v15, %v1760_v59 }
0x227b   :  { %v3379_v6 = vadd.f32 %v1766_v51, %v1765_v12 }
0x227d   :  { %v1768_v49 = vpack.c.bf16 %v3379_v6, %v3379_v6 }
0x227f   :  { %1770 = vrot.lane.b32.xlu1 %v1768_v49, %s2846_s8 }
0x22f1   :  { %v1771_v17 = vpop.permute.xlu1 %1770 }
0x22f2   :  { %2554 = vmatmul.mubr.msk.bf16.vlgmr.msra.gmra.mxu0 %vm236_vm2, %v1771_v17 }
0x22f3   :  { %2566 = vmatpush3.bf16.msra.mxu0 %v3306_v19  ;;  %2569 = vmatprep.mubr.msk.bf16.mxu0 %vm2844_vm0, %v2843_v0 }
0x22f4   :  { %2567 = vmatprep.subr.bf16.mxu0 %v2843_v0 }
0x22f7   :  { %2568 = vmatpush3.bf16.msra.mxu0 %v3312_v20 }
0x22f8   :  { %2581 = vmatprep.subr.bf16.mxu0 %v2843_v0 }
0x23b2   :  { %v1809_v16 = vpop.f32.mrf.mxu0 }
0x23b3   :  { %v1810_v4 = vadd.f32 %v1809_v16, %v1696_v33 }
0x23b4   :  { %v2555_v22 = vpop.f32.mrf.mxu0 }
0x23b5   :  { %v1815_v14 = vadd.f32 %v3394_v23, %v1810_v4 }
0x23b6   :  { %v1812_v19 = vpop.f32.mrf.mxu0 }
0x23b7   :  { %1823 = vrot.lane.b32.xlu0 %v1815_v14, %s2845_s26  ;;  %v2222_v25 = vmul.f32 -1.442695, %v1815_v14 }
0x23b8   :  { %v2556_v24 = vpop.f32.mrf.mxu0 }
0x23b9   :  { %2701 = vpow2.f32 %v2222_v25 }
0x23c6   :  { %v2702_v26 = vpop.eup %2701 }
0x23c7   :  { %v1819_v20 = vadd.f32 1.0, %v2702_v26 }
0x23c9   :  { %2703 = vrcp.f32 %v1819_v20 }
0x23d6   :  { %v2704_v28 = vpop.eup %2703 }
0x23d7   :  { %v1833_v32 = vsub.f32 1.0, %v2704_v28  ;;  %v1839_v3 = vmul.f32 %v2704_v28, %v3321_v39  ;;  %v2727_v39 = vld [vmem:[#allocation7 + $0x8] sm:$0xff]  }
0x2429   :  { %v1824_v29 = vpop.permute.xlu0 %1823 }
0x242a   :  { %v1826_v18 = vmul.f32 %v2704_v28, %v1824_v29 }
0x242c   :  { %1828 = vrot.lane.b32.xlu1 %v1826_v18, %s2840_s22 }
0x249e   :  { %v1829_v1 = vpop.permute.xlu1 %1828 }
0x249f   :  { %v1831_v30 = vadd.f32 %v1829_v1, %v1815_v14 }
0x24a1   :  { %2705 = vtanh.f32 %v1831_v30 }
0x24ae   :  { %v2706_v31 = vpop.eup %2705 }
0x24af   :  { %1835 = vrot.lane.b32.xlu0 %v2706_v31, %s2846_s8 }
0x2521   :  { %v1836_v35 = vpop.permute.xlu0 %1835 }
0x2522   :  { %v1838_v52 = vmul.f32 %v1836_v35, %v1833_v32 }
0x2524   :  { %v3401_v36 = vadd.f32 %v1839_v3, %v1838_v52 }
0x2526   :  { %v1841_v27 = vpack.c.bf16 %v3401_v36, %v3401_v36 }
0x2528   :  { %1843 = vrot.lane.b32.xlu1 %v1841_v27, %s2846_s8 }
0x259a   :  { %v1844_v38 = vpop.permute.xlu1 %1843 }
0x259b   :  { %2562 = vmatmul.mubr.msk.bf16.vlgmr.msra.gmra.mxu1 %vm236_vm2, %v1844_v38  ;;  %2570 = vmatmul.mubr.msk.bf16.vlgmr.msra.gmra.mxu0 %vm236_vm2, %v1844_v38 }
0x259c   :  { %2574 = vmatpush3.bf16.msra.mxu1 %v3331_v44  ;;  %2577 = vmatprep.mubr.msk.bf16.mxu1 %vm2844_vm0, %v2843_v0 }
0x259d   :  { %2575 = vmatprep.subr.bf16.mxu1 %v2843_v0  ;;  %2582 = vmatpush3.bf16.msra.mxu0 %v3340_v34  ;;  %v3426_v34 = vld [vmem:[%s3464_s9] ss:$0 sm:$0xff]  ;;  %s2847_s9 = smov [#allocation9]  }
0x259e   :  { %2583 = vmatprep.subr.bf16.mxu0 %v2843_v0  ;;  %2585 = vmatprep.mubr.msk.bf16.mxu0 %vm2844_vm0, %v2843_v0 }
0x25a0   :  { %2576 = vmatpush3.bf16.msra.mxu1 %v3349_v45 }
0x25a1   :  { %2584 = vmatpush3.bf16.msra.mxu0 %v3355_v8  ;;  %2589 = vmatprep.subr.bf16.mxu1 %v2843_v0 }
0x25a3   :  { %2578 = vmatmul.mubr.msk.bf16.vlgmr.msra.gmra.mxu1 %vm236_vm2, %v1771_v17 }
0x25a4   :  { %2590 = vmatpush3.bf16.msra.mxu1 %v2727_v39  ;;  %2593 = vmatprep.mubr.msk.bf16.mxu1 %vm2844_vm0, %v2843_v0 }
0x25a5   :  { %2591 = vmatprep.subr.bf16.mxu1 %v2843_v0  ;;  %v199_v0 = vadd.f32 %v3371_v56, %v3037_v50 }
0x25a8   :  { %2592 = vmatpush3.bf16.msra.mxu1 %v2728_v41 }
0x265b   :  { %v1882_v42 = vpop.f32.mrf.mxu1  ;;  %v1923_v44 = vpop.f32.mrf.mxu0 }
0x265c   :  { %v1883_v45 = vadd.f32 %v3426_v34, %v1882_v42 }
0x265d   :  { %v2563_v8 = vpop.f32.mrf.mxu1  ;;  %v2571_v9 = vpop.f32.mrf.mxu0 }
0x265e   :  { %1888 = vst [vmem:[#allocation8 + $0x30] sm:$0xff] %v1883_v45 }
0x265f   :  { %v1885_v33 = vpop.f32.mrf.mxu1  ;;  %v1926_v37 = vpop.f32.mrf.mxu0 }
0x2661   :  { %v2564_v40 = vpop.f32.mrf.mxu1  ;;  %v2572_v53 = vpop.f32.mrf.mxu0 }
0x2663   :  { %v1963_v54 = vpop.f32.mrf.mxu1 }
0x2664   :  { %v1969_v47 = vadd.f32 %v1963_v54, %v199_v0 }
0x2665   :  { %v2579_v55 = vpop.f32.mrf.mxu1 }
0x2666   :  { %1977 = vrot.lane.b32.xlu0 %v1969_v47, %s2845_s26  ;;  %v2226_v57 = vmul.f32 -1.442695, %v1969_v47 }
0x2667   :  { %v1966_v7 = vpop.f32.mrf.mxu1 }
0x2668   :  { %2707 = vpow2.f32 %v2226_v57 }
0x2669   :  { %v2580_v10 = vpop.f32.mrf.mxu1 }
0x2675   :  { %v2708_v58 = vpop.eup %2707 }
0x2676   :  { %v1973_v60 = vadd.f32 1.0, %v2708_v58 }
0x2678   :  { %2709 = vrcp.f32 %v1973_v60 }
0x2685   :  { %v2710_v21 = vpop.eup %2709 }
0x2686   :  { %v1987_v56 = vsub.f32 1.0, %v2710_v21  ;;  %v1993_v2 = vmul.f32 %v2710_v21, %v3379_v6 }
0x26d8   :  { %v1978_v61 = vpop.permute.xlu0 %1977 }
0x26d9   :  { %v1980_v13 = vmul.f32 %v2710_v21, %v1978_v61 }
0x26db   :  { %1982 = vrot.lane.b32.xlu1 %v1980_v13, %s2840_s22 }
0x274d   :  { %v1983_v43 = vpop.permute.xlu1 %1982 }
0x274e   :  { %v1985_v62 = vadd.f32 %v1983_v43, %v1969_v47 }
0x2750   :  { %2711 = vtanh.f32 %v1985_v62 }
0x275d   :  { %v2712_v50 = vpop.eup %2711 }
0x275e   :  { %1989 = vrot.lane.b32.xlu0 %v2712_v50, %s2846_s8 }
0x27d0   :  { %v1990_v63 = vpop.permute.xlu0 %1989 }
0x27d1   :  { %v1992_v5 = vmul.f32 %v1990_v63, %v1987_v56 }
0x27d3   :  { %v1994_v46 = vadd.f32 %v1993_v2, %v1992_v5 }
0x27d5   :  { %v1995_v11 = vpack.c.bf16 %v1994_v46, %v1994_v46 }
0x27d7   :  { %1997 = vrot.lane.b32.xlu1 %v1995_v11, %s2846_s8 }
0x2849   :  { %v1998_v48 = vpop.permute.xlu1 %1997 }
0x284a   :  { %2586 = vmatmul.mubr.msk.bf16.vlgmr.msra.gmra.mxu0 %vm236_vm2, %v1998_v48 }
0x290a   :  { %v2036_v59 = vpop.f32.mrf.mxu0 }
0x290b   :  { %v2037_v15 = vadd.f32 %v2036_v59, %v1923_v44 }
0x290c   :  { %v2587_v51 = vpop.f32.mrf.mxu0 }
0x290d   :  { %v2042_v12 = vadd.f32 %v3394_v23, %v2037_v15 }
0x290e   :  { %v2039_v49 = vpop.f32.mrf.mxu0 }
0x290f   :  { %2050 = vrot.lane.b32.xlu0 %v2042_v12, %s2845_s26  ;;  %v2228_v16 = vmul.f32 -1.442695, %v2042_v12 }
0x2910   :  { %v2588_v17 = vpop.f32.mrf.mxu0 }
0x2911   :  { %2713 = vpow2.f32 %v2228_v16 }
0x291e   :  { %v2714_v6 = vpop.eup %2713 }
0x291f   :  { %v2046_v4 = vadd.f32 1.0, %v2714_v6 }
0x2921   :  { %2715 = vrcp.f32 %v2046_v4 }
0x292e   :  { %v2716_v22 = vpop.eup %2715 }
0x292f   :  { %v2060_v23 = vsub.f32 1.0, %v2716_v22  ;;  %v2066_v28 = vmul.f32 %v2716_v22, %v3401_v36 }
0x2981   :  { %v2051_v14 = vpop.permute.xlu0 %2050 }
0x2982   :  { %v2053_v19 = vmul.f32 %v2716_v22, %v2051_v14 }
0x2984   :  { %2055 = vrot.lane.b32.xlu1 %v2053_v19, %s2840_s22  ;;  %s2144_s22 = sshll.u32 %s2847_s9, 4  ;;  %s2145_s22 = int_to_ptr.vmem [resolvable:$true] %s2144_s22 }
0x2985   :  { %s2790_s26 = scalar_lea.vmem %s2145_s22, 256  ;;  %p2795_p2 = scmp.lt.s32.totalorder %s2145_s22, %s2145_s22 }
0x2986   :  { %p2791_p1 = scmp.ne.s32.totalorder %s2145_s22, %s2790_s26  ;;  %p2796_p3 = scmp.lt.s32.totalorder %s2790_s26, %s2790_s26 }
0x2988   :  { %p2797_p4 = por %p2796_p3, %p2795_p2 }
0x298a   :  { %p2798_p5 = pnand %p2797_p4, %p2791_p1 }
0x29f6   :  { %v2056_v24 = vpop.permute.xlu1 %2055 }
0x29f7   :  { %v2058_v25 = vadd.f32 %v2056_v24, %v2042_v12 }
0x29f9   :  { %2717 = vtanh.f32 %v2058_v25 }
0x2a06   :  { %v2718_v26 = vpop.eup %2717 }
0x2a07   :  { %2062 = vrot.lane.b32.xlu0 %v2718_v26, %s2846_s8 }
0x2a0b   :  { %2117 = vrot.lane.b32.xlu0 %v1994_v46, %s2846_s8 }
0x2a79   :  { %v2063_v20 = vpop.permute.xlu0 %2062 }
0x2a7a   :  { %v2065_v29 = vmul.f32 %v2063_v20, %v2060_v23 }
0x2a7c   :  { %v2067_v18 = vadd.f32 %v2066_v28, %v2065_v29 }
0x2a7d   :  { %v2118_v1 = vpop.permute.xlu0 %2117 }
0x2a7e   :  { %2120 = vst.msk [vmem:[#allocation9] sm:$0xff] %vm236_vm2, %v2118_v1  ;;  %v2068_v30 = vpack.c.bf16 %v2067_v18, %v2067_v18 }
0x2a80   :  { %2070 = vrot.lane.b32.xlu1 %v2068_v30, %s2846_s8 }
0x2a84   :  { %2122 = vrot.lane.b32.xlu1 %v2067_v18, %s2846_s8 }
0x2af2   :  { %v2071_v31 = vpop.permute.xlu1 %2070 }
0x2af3   :  { %2594 = vmatmul.mubr.msk.bf16.vlgmr.msra.gmra.mxu1 %vm236_vm2, %v2071_v31 }
0x2af6   :  { %v2123_v32 = vpop.permute.xlu1 %2122 }
0x2af7   :  { %2126 = vst.msk [vmem:[#allocation9 + $0x8] sm:$0xff] %vm236_vm2, %v2123_v32 }
0x2af8   :  { %2801 = shalt.err (!%p2798_p5)
}
0x2af9   :  { %s2848_s28 = smov 128   ;;  %s2849_s29 = smov 8  }
0x2afa   :  { %2150 = dma.vmem_to_hbm [thread:$0]  %s2145_s22, 256, %s3466_s11, [#allocation10], %s2848_s28, %s2848_s28, %s2849_s29  }
0x2afb   :  { %s2850_s6 = smov [#allocation8]  }
0x2afc   :  { %s2132_s13 = sshll.u32 %s2850_s6, 4  ;;  %s2133_s13 = int_to_ptr.vmem [resolvable:$true] %s2132_s13 }
0x2afd   :  { %s2810_s2 = scalar_lea.vmem %s2133_s13, 1024  ;;  %p2815_p7 = scmp.lt.s32.totalorder %s2133_s13, %s2133_s13 }
0x2afe   :  { %p2811_p6 = scmp.ne.s32.totalorder %s2133_s13, %s2810_s2  ;;  %p2816_p8 = scmp.lt.s32.totalorder %s2810_s2, %s2810_s2 }
0x2b00   :  { %p2817_p9 = por %p2816_p8, %p2815_p7 }
0x2b02   :  { %p2818_p10 = pnand %p2817_p9, %p2811_p6 }
0x2bb3   :  { %v2109_v35 = vpop.f32.mrf.mxu1 }
0x2bb4   :  { %v2110_v3 = vadd.f32 %v3426_v34, %v2109_v35 }
0x2bb5   :  { %v2595_v52 = vpop.f32.mrf.mxu1 }
0x2bb6   :  { %2115 = vst [vmem:[#allocation8 + $0x38] sm:$0xff] %v2110_v3 }
0x2bb7   :  { %v2112_v36 = vpop.f32.mrf.mxu1 }
0x2bb8   :  { %2821 = shalt.err (!%p2818_p10)
}
0x2bb9   :  { %2138 = dma.vmem_to_hbm [thread:$0]  %s2133_s13, 1024, %s3465_s10, [#allocation4], %s2848_s28, %s2848_s28, %s2849_s29   ;;  %v2596_v27 = vpop.f32.mrf.mxu1 }
0x2bba   :  { %2834 = dma.done.wait [#allocation4], 1024  }
0x2bbb   :  { %2835 = vsyncadd [#allocation4], 4294966272 }
0x2bbc   :  { %2836 = dma.done.wait [#allocation10], 256  }
0x2bbd   :  { %2837 = vsyncadd [#allocation10], 4294967040 }
0x2bbe   :  { %2157 = vsyncpa [#allocation3], 1 }
0x2bbf   :  { %2158 = vsyncpa [#allocation6], 1 }
0x2bc0   :  { %2159 = vsyncpa [#allocation4], 1 }
0x2bc1   :  { %2160 = vsyncpa [#allocation10], 1 }

</bundles_post_ra>
